<compile_context>
chip_gen: v7x
topology: tpu7x:2x2x1
jax: 0.10.0
libtpu: 0.0.40
codegen_flags: <defaults>
</compile_context>

<pallas_src>
import math
import jax
import jax.numpy as jnp
from jax.experimental import pallas as pl
from jax.experimental.pallas import tpu as pltpu

# head sizes: old_model.classifier (1010), classifier1..6 (3,4,9,34,57,72)
HEAD_DIMS = (1010, 3, 4, 9, 34, 57, 72)
FEAT = 1000
FEAT_PAD = 1024                      # K padded to a clean multiple of 128
C_TOTAL = sum(HEAD_DIMS)             # 1189
C_PAD = 1280                         # N padded to 10 x 128 (lane-dense)
TN = 640                             # class-axis tile (2 grid steps)


def _multihead_kernel(x_ref, w_ref, b_ref, o_ref):
    # bf16 x bf16 MXU matmul with f32 accumulation, f32 bias add on the VPU.
    o_ref[...] = (
        jnp.dot(x_ref[...], w_ref[...], preferred_element_type=jnp.float32)
        + b_ref[...]
    )


def multihead_linear(x_pad, w_cat, b_cat):
    """x_pad: [B, FEAT_PAD] bf16, w_cat: [FEAT_PAD, C_PAD] bf16, b_cat: [1, C_PAD] f32."""
    B = x_pad.shape[0]
    grid = (C_PAD // TN,)
    cost = pl.CostEstimate(
        flops=2 * B * FEAT_PAD * C_PAD,
        bytes_accessed=(FEAT_PAD * C_PAD * 2    # bf16 weights (dominant)
                        + B * FEAT_PAD * 2      # bf16 activations
                        + C_PAD * 4             # f32 bias
                        + B * C_PAD * 4),       # f32 output
        transcendentals=0,
    )
    return pl.pallas_call(
        _multihead_kernel,
        out_shape=jax.ShapeDtypeStruct((B, C_PAD), jnp.float32),
        grid=grid,
        in_specs=[
            pl.BlockSpec((B, FEAT_PAD), lambda j: (0, 0)),   # x reused per tile
            pl.BlockSpec((FEAT_PAD, TN), lambda j: (0, j)),  # weight tile
            pl.BlockSpec((1, TN), lambda j: (0, j)),         # bias tile
        ],
        out_specs=pl.BlockSpec((B, TN), lambda j: (0, j)),
        compiler_params=pltpu.CompilerParams(
            dimension_semantics=("parallel",),
        ),
        cost_estimate=cost,
    )(x_pad, w_cat, b_cat)


def init_params(key):
    """PyTorch-Linear-style init for all 7 heads, concatenated (f32, unpadded)."""
    keys = jax.random.split(key, 2 * len(HEAD_DIMS))
    bound = 1.0 / math.sqrt(FEAT)
    ws, bs = [], []
    for i, c in enumerate(HEAD_DIMS):
        w = jax.random.uniform(keys[2 * i], (FEAT, c), jnp.float32, -bound, bound)
        b = jax.random.uniform(keys[2 * i + 1], (1, c), jnp.float32, -bound, bound)
        ws.append(w)
        bs.append(b)
    return jnp.concatenate(ws, axis=1), jnp.concatenate(bs, axis=1)


def prepare_params(w_cat_f32, b_cat_f32):
    """Zero-pad K->1024, N->1280; cast weights to bf16 (done once at init)."""
    w_pad = jnp.zeros((FEAT_PAD, C_PAD), jnp.float32)
    w_pad = w_pad.at[:FEAT, :C_TOTAL].set(w_cat_f32)
    b_pad = jnp.zeros((1, C_PAD), jnp.float32)
    b_pad = b_pad.at[:, :C_TOTAL].set(b_cat_f32)
    return w_pad.astype(jnp.bfloat16), b_pad


def model_multi_forward(x_feat, w_cat_bf16, b_cat_f32):
    """Equivalent of Model_multi.forward applied to the backbone feature x.

    x_feat: [B, 1000] (backbone output, any float dtype).
    Returns (logits1010, logits3, logits4, logits9, logits34, logits57, logits72),
    each f32.
    """
    B = x_feat.shape[0]
    x_pad = jnp.zeros((B, FEAT_PAD), jnp.float32).at[:, :FEAT].set(
        x_feat.astype(jnp.float32)
    ).astype(jnp.bfloat16)
    out = multihead_linear(x_pad, w_cat_bf16, b_cat_f32)
    logits = []
    off = 0
    for c in HEAD_DIMS:
        logits.append(out[:, off:off + c])
        off += c
    return tuple(logits)


if __name__ == "__main__":
    key = jax.random.PRNGKey(0)
    k_x, k_p = jax.random.split(key)

    B = 2
    # Stand-in for the resnet50 feature-extractor output: [B, 1000] features.
    x_feat = jax.random.normal(k_x, (B, FEAT), dtype=jnp.float32)
    w_cat_f32, b_cat_f32 = init_params(k_p)
    w_cat_bf16, b_cat_pad = prepare_params(w_cat_f32, b_cat_f32)

    logits = model_multi_forward(x_feat, w_cat_bf16, b_cat_pad)
    logits = jax.block_until_ready(logits)

    # sanity checks: shapes and numerical agreement with a plain-JAX reference
    # (reference uses the same bf16-rounded operands; tolerance accounts only
    # for MXU-vs-XLA rounding differences).
    assert tuple(l.shape for l in logits) == tuple((B, c) for c in HEAD_DIMS)
    x_bf = x_feat.astype(jnp.bfloat16).astype(jnp.float32)
    w_bf = w_cat_bf16[:FEAT, :C_TOTAL].astype(jnp.float32)
    ref = x_bf @ w_bf + b_cat_f32
    off = 0
    for l, c in zip(logits, HEAD_DIMS):
        assert jnp.allclose(l, ref[:, off:off + c], atol=1e-2, rtol=1e-2)
        off += c

    print("KERNEL_OK")
</pallas_src>

<mosaic_0001>
module attributes {stable_mosaic.version = 11 : i64} {
  func.func @_multihead_kernel(%arg0: i32, %arg1: memref<2x1024xbf16, #tpu.memory_space<vmem>>, %arg2: memref<1024x640xbf16, #tpu.memory_space<vmem>>, %arg3: memref<1x640xf32, #tpu.memory_space<vmem>>, %arg4: memref<2x640xf32, #tpu.memory_space<vmem>>) attributes {dimension_semantics = [#tpu.dimension_semantics<parallel>], iteration_bounds = array<i64: 2>, scalar_prefetch = 0 : i64, scratch_operands = 0 : i64, tpu.core_type = #tpu.core_type<tc>, window_params = [{pipeline_mode = #tpu.pipeline_mode<synchronous>, transform_indices = @transform_0, window_bounds = array<i64: 2, 1024>}, {transform_indices = @transform_1, window_bounds = array<i64: 1024, 640>}, {transform_indices = @transform_2, window_bounds = array<i64: 1, 640>}, {transform_indices = @transform_3, window_bounds = array<i64: 2, 640>}]} {
    %c0 = arith.constant 0 : index
    %c0_0 = arith.constant 0 : index
    %0 = vector.load %arg1[%c0, %c0_0] : memref<2x1024xbf16, #tpu.memory_space<vmem>>, vector<2x1024xbf16>
    %c0_1 = arith.constant 0 : index
    %c0_2 = arith.constant 0 : index
    %1 = vector.load %arg2[%c0_1, %c0_2] : memref<1024x640xbf16, #tpu.memory_space<vmem>>, vector<1024x640xbf16>
    %cst = arith.constant dense<0.000000e+00> : vector<2x640xf32>
    %2 = tpu.matmul %0, %1, %cst {dimension_numbers = #tpu.dot_dimension_numbers<[1], [0], [0], [1], [0, 0, 1, 1], [], []>} : vector<2x1024xbf16>, vector<1024x640xbf16>, vector<2x640xf32> -> vector<2x640xf32>
    %c0_3 = arith.constant 0 : index
    %c0_4 = arith.constant 0 : index
    %3 = vector.load %arg3[%c0_3, %c0_4] : memref<1x640xf32, #tpu.memory_space<vmem>>, vector<1x640xf32>
    %4 = vector.broadcast %3 : vector<1x640xf32> to vector<2x640xf32>
    %5 = arith.addf %2, %4 : vector<2x640xf32>
    %c0_5 = arith.constant 0 : index
    %c0_6 = arith.constant 0 : index
    %6 = vector.load %arg4[%c0_5, %c0_6] : memref<2x640xf32, #tpu.memory_space<vmem>>, vector<2x640xf32>
    tpu.vector_store %arg4[%c0_5, %c0_6], %5 {strides = array<i32>} : memref<2x640xf32, #tpu.memory_space<vmem>>, vector<2x640xf32>,
    return
  }
  func.func @transform_0(%arg0: i32) -> (i32, i32) {
    %c0_i32 = arith.constant 0 : i32
    %c0_i32_0 = arith.constant 0 : i32
    %c0_i32_1 = arith.constant 0 : i32
    return %c0_i32, %c0_i32_0 : i32, i32
  }
  func.func @transform_1(%arg0: i32) -> (i32, i32) {
    %c0_i32 = arith.constant 0 : i32
    %c0_i32_0 = arith.constant 0 : i32
    return %c0_i32, %arg0 : i32, i32
  }
  func.func @transform_2(%arg0: i32) -> (i32, i32) {
    %c0_i32 = arith.constant 0 : i32
    %c0_i32_0 = arith.constant 0 : i32
    return %c0_i32, %arg0 : i32, i32
  }
  func.func @transform_3(%arg0: i32) -> (i32, i32) {
    %c0_i32 = arith.constant 0 : i32
    %c0_i32_0 = arith.constant 0 : i32
    return %c0_i32, %arg0 : i32, i32
  }
}

</mosaic_0001>

<bundles_post_ra>
// kernel: tpu_custom_call.1
= control target key start
LH: loop header
LB: loop body
LE: loop exit
PB: predicated region body
PF: predicated region fallthrough
CT: control target
= control target key end

     0   :  { %8 = vsyncpa [#allocation3], 0  ;;  %s4801_s0 = inlined_call_operand.hbm [shape: bf16[2,1024], index: 0, kind: input, shape index: {}]   ;;  %s4802_s1 = inlined_call_operand.hbm [shape: bf16[1024,1280], index: 1, kind: input, shape index: {}]   ;;  %s4803_s2 = inlined_call_operand.hbm [shape: f32[1,1280], index: 2, kind: input, shape index: {}]   ;;  %s4804_s3 = inlined_call_operand.hbm [shape: f32[2,1280], index: 3, kind: output, shape index: {}]  }
   0x1   :  { %9 = vsyncpa [#allocation6], 0 }
   0x2   :  { %11 = vsyncpa [#allocation6 + $0x1], 0 }
   0x3   :  { %12 = vsyncpa [#allocation4], 0 }
   0x4   :  { %14 = vsyncpa [#allocation4 + $0x1], 0  ;;  %s4174_s12 = smov 0   ;;  %s4176_s13 = smov 0  }
   0x5   :  { %s4178_s14 = smov 0   ;;  %s4180_s15 = smov 0  }
   0x6 LB: > { %s4195_s16 = sadd.s32 1, %s4143_s15   ;;  %s48_s17 = sadd.s32 1, %s4139_s14  ;;  %s4143_s15 = sphi %s4180_s15, %s4831_s15   ;;  %s4139_s14 = sphi %s4178_s14, %s4830_s14   ;;  %s4135_s13 = sphi %s4176_s13, %s4829_s13   ;;  %s4131_s12 = sphi %s4174_s12, %s4828_s12  }
   0x7   : > { %s45_s18 = ssub.s32 %s4143_s15, %s4195_s16  ;;  %p55_p0 = scmp.ne.s32.totalorder %s4139_s14, %s4135_s13 }
   0x8   : > { %p46_p1 = scmp.eq.s32.totalorder %s45_s18, 0  ;;  %p56_p2 = scmp.eq.s32.totalorder %s4143_s15, 0 }
   0x9   : > { %p3495_p4 = scmp.lt.s32.totalorder %s4143_s15, 2  ;;  %s148_s20 = sand.u32 1, %s4143_s15  }
   0xa   : > { %s4206_s19 = scalar_select %p46_p1, %s4139_s14, %s48_s17  }
   0xb   : > { %p57_p5 = por %p56_p2, %p55_p0  ;;  %s150_s21 = sand.u32 1, %s4139_s14  }
   0xc   : > { %s3464_s22 = smul.u32 2560, %s150_s21  ;;  %s4227_s30 = scalar_lea.sflag [#allocation6], %s148_s20 }
   0xd   : > { %p4215_p6 = pnand %p3495_p4, %p57_p5  ;;  %s3345_s24 = smul.u32 320, %s4143_s15 }
   0xe   : > { %s152_s28 = scalar_lea.vmem [#allocation5], %s3464_s22  ;;  %s3990_s7 = scalar_lea.hbm %s4802_s1, 81920 }
   0xf   : > { %s4812_s23 = scalar_select %p4215_p6, 1, 0 }
  0x10   : > { %s4223_s27 = scalar_lea.hbm %s4802_s1, %s3345_s24  ;;  %s159_s29 = sshll.u32 %s152_s28, 4  ;;  %s4225_s29 = int_to_ptr.vmem [resolvable:$true] %s159_s29 }
  0x11   : > { %s3985_s4 = scalar_lea.hbm %s4223_s27, 40960  ;;  %p4806_p8 = pneg %p4215_p6 }
  0x12   : > { %p3986_p7 = scmp.ne.s32.totalorder %s4223_s27, %s3985_s4  ;;  %p3991_p11 = scmp.lt.u32.totalorder %s4223_s27, %s4802_s1 }
  0x13   : > { %p3992_p12 = scmp.lt.u32.totalorder %s3990_s7, %s3985_s4  ;;  %p3994_p1 = scmp.lt.u32.totalorder %s3985_s4, %s4223_s27 }
  0x14   : > { %p3988_p9 = pnand %p4806_p8, %p3986_p7 }
  0x15   : > { %p3993_p13 = por %p3992_p12, %p3991_p11 }
  0x16   : > { %p3989_p10 = pneg %p3988_p9 }
  0x17   : > { %p3995_p2 = por %p3994_p1, %p3993_p13 }
  0x19   : > { %p3996_p4 = pnand %p3995_p2, %p3989_p10 }
  0x1b   : > { %3999 = shalt.err (!%p3996_p4)
}
  0x1c   : > { %s4000_s10 = scalar_lea.vmem %s4225_s29, 40960  ;;  %s4145_s11 = smov [#allocation5]  }
  0x1d   : > { %p4001_p5 = scmp.ne.s32.totalorder %s4225_s29, %s4000_s10  ;;  %s4005_s17 = sshll.u32 %s4145_s11, 4  ;;  %s4006_s17 = int_to_ptr.vmem [resolvable:$false] %s4005_s17 }
  0x1e   : > { %s4007_s18 = scalar_lea.vmem %s4006_s17, 81920  ;;  %p4008_p3 = scmp.lt.s32.totalorder %s4225_s29, %s4006_s17 }
  0x1f   : > { %p4003_p7 = pnand %p4001_p5, %p4806_p8  ;;  %p4009_p11 = scmp.lt.s32.totalorder %s4007_s18, %s4000_s10 }
  0x21   : > { %p4004_p9 = pneg %p4003_p7  ;;  %p4010_p12 = por %p4009_p11, %p4008_p3 }
  0x23   : > { %p4011_p13 = pnand %p4010_p12, %p4004_p9 }
  0x25   : > { %4014 = shalt.err (!%p4011_p13)
}
  0x26   : > { %s4146_s20 = smov 640   ;;  %s4147_s22 = smov 320  }
  0x27   : > { %s4148_s24 = smov 20   ;;  %s4256_s25 = sadd.s32 4294967295, %s4143_s15  }
  0x28   : > { %3486 = dma.hbm_to_vmem [thread:$0]  (!%p4215_p6), %s4223_s27, 40960, %s4225_s29, %s4227_s30, %s4146_s20, %s4147_s22, %s4148_s24  }
  0x29   : > { %s3013_s26 = sadd.s32 4294967294, %s4143_s15   ;;  %p61_p3 = scmp.ne.s32.totalorder %s4135_s13, %s4131_s12 }
  0x2a   : > { %p4805_p10 = scmp.eq.s32.totalorder %s4256_s25, 0  ;;  %p111_p1 = scmp.eq.s32.totalorder %s4256_s25, 1 }
  0x2b   : > { %p117_p2 = scmp.eq.s32.totalorder %s3013_s26, 1  ;;  %p3014_p4 = scmp.ge.s32.totalorder %s4143_s15, 1 }
  0x2c   : > { %p4266_p5 = por %p4805_p10, %p61_p3  ;;  %p4273_p7 = por %p111_p1, %p55_p0 }
  0x2d   : > { %p4277_p9 = por %p117_p2, %p61_p3  ;;  %p124_p11 = scmp.lt.s32.totalorder %s4143_s15, 3 }
  0x2e   : > { %s4813_s28 = scalar_select %p4266_p5, 1, 0 }
  0x2f   : > { %s4814_s27 = scalar_select %p4273_p7, 1, 0 }
  0x30   : > { %s4815_s29 = scalar_select %p4277_p9, 1, 0 }
  0x31   : > { %p4282_p12 = pnand %p3014_p4, %p124_p11  ;;  %s4149_s5 = smov [#allocation2]  }
  0x32   : > { %s137_s6 = sshll.u32 %s4149_s5, 4  ;;  %s3465_s7 = smul.u32 5, %s150_s21  ;;  %s138_s6 = int_to_ptr.vmem [resolvable:$true] %s137_s6 }
  0x33   : > { %s4816_s4 = scalar_select %p4282_p12, 1, 0 }
  0x34   : > { %p3479_p13 = pneg %p4282_p12  ;;  %s3346_s8 = smul.u32 80, %s4143_s15 }
  0x35   : > { %s173_s18 = scalar_lea.vmem [#allocation7], %s3465_s7  ;;  %s4015_s24 = scalar_lea.hbm %s4801_s0, 128 }
  0x36   : > { %p4293_p0 = pnand %p3479_p13, %p4805_p10  ;;  %s4300_s17 = scalar_lea.hbm %s4803_s2, %s3346_s8 }
  0x37   : > { %s181_s20 = sshll.u32 %s173_s18, 4  ;;  %p4016_p3 = scmp.ne.s32.totalorder %s4801_s0, %s4015_s24  ;;  %s4302_s20 = int_to_ptr.vmem [resolvable:$true] %s181_s20 }
  0x38   : > { %p4017_p1 = pneg %p4293_p0  ;;  %p4022_p11 = scmp.lt.u32.totalorder %s4015_s24, %s4801_s0 }
  0x3a   : > { %p4018_p2 = pnand %p4017_p1, %p4016_p3 }
  0x3c   : > { %p4019_p4 = pneg %p4018_p2 }
  0x3e   : > { %p4024_p13 = pnand %p4022_p11, %p4019_p4 }
  0x40   : > { %4027 = shalt.err (!%p4024_p13)
}
  0x41   : > { %s4028_s7 = scalar_lea.vmem %s138_s6, 128  ;;  %p4036_p7 = scmp.lt.s32.totalorder %s138_s6, %s138_s6 }
  0x42   : > { %p4029_p10 = scmp.ne.s32.totalorder %s138_s6, %s4028_s7  ;;  %p4037_p5 = scmp.lt.s32.totalorder %s4028_s7, %s4028_s7 }
  0x44   : > { %p4031_p8 = pnand %p4029_p10, %p4017_p1  ;;  %p4038_p12 = por %p4037_p5, %p4036_p7 }
  0x46   : > { %p4032_p9 = pneg %p4031_p8 }
  0x48   : > { %p4039_p6 = pnand %p4038_p12, %p4032_p9 }
  0x4a   : > { %4042 = shalt.err (!%p4039_p6)
}
  0x4b   : > { %3482 = dma.hbm_to_vmem [thread:$0]  (!%p4293_p0), %s4801_s0, 128, %s138_s6, [#allocation3]  }
  0x4c   : > { %s4043_s21 = scalar_lea.hbm %s4300_s17, 80  ;;  %p4818_p10 = scmp.ne.s32.totalorder %s4812_s23, 0 }
  0x4d   : > { %p4044_p3 = scmp.ne.s32.totalorder %s4300_s17, %s4043_s21  ;;  %s4048_s26 = scalar_lea.hbm %s4803_s2, 160 }
  0x4e   : > { %p4819_p8 = pneg %p4818_p10  ;;  %p4049_p6 = scmp.lt.u32.totalorder %s4300_s17, %s4803_s2 }
  0x4f   : > { %p4050_p5 = scmp.lt.u32.totalorder %s4048_s26, %s4043_s21  ;;  %p4052_p9 = scmp.lt.u32.totalorder %s4043_s21, %s4300_s17 }
  0x50   : > { %p4046_p1 = pnand %p4044_p3, %p4819_p8 }
  0x51   : > { %p4051_p7 = por %p4050_p5, %p4049_p6 }
  0x52   : > { %p4047_p2 = pneg %p4046_p1 }
  0x53   : > { %p4053_p12 = por %p4052_p9, %p4051_p7 }
  0x55   : > { %p4054_p4 = pnand %p4053_p12, %p4047_p2 }
  0x57   : > { %4057 = shalt.err (!%p4054_p4)
}
  0x58   : > { %s4058_s6 = scalar_lea.vmem %s4302_s20, 80  ;;  %p4820_p11 = pmov %p4819_p8 }
  0x59   : > { %p4059_p0 = scmp.ne.s32.totalorder %s4302_s20, %s4058_s6  ;;  %s4150_s10 = smov [#allocation7]  }
  0x5a   : > { %s4063_s11 = sshll.u32 %s4150_s10, 4  ;;  %s4064_s11 = int_to_ptr.vmem [resolvable:$false] %s4063_s11 }
  0x5b   : > { %p4061_p13 = pnand %p4059_p0, %p4820_p11  ;;  %s4065_s7 = scalar_lea.vmem %s4064_s11, 160 }
  0x5c   : > { %p4066_p8 = scmp.lt.s32.totalorder %s4302_s20, %s4064_s11  ;;  %p4067_p1 = scmp.lt.s32.totalorder %s4065_s7, %s4058_s6 }
  0x5d   : > { %p4062_p3 = pneg %p4061_p13 }
  0x5e   : > { %p4068_p6 = por %p4067_p1, %p4066_p8 }
  0x60   : > { %p4069_p5 = pnand %p4068_p6, %p4062_p3 }
  0x62   : > { %4072 = shalt.err (!%p4069_p5)
}
  0x63   : > { %3489 = dma.hbm_to_vmem [thread:$0]  (!%p4818_p10), %s4300_s17, 80, %s4302_s20, %s4227_s30  }
  0x64   : > { %p4821_p2 = scmp.ne.s32.totalorder %s4816_s4, 0 }
  0x65   : > { %p4822_p7 = scmp.eq.s32.totalorder (!%p4821_p2), %s4256_s25, 0 }
  0x66   : > { %190 = sbr.rel (%p4821_p2) target bundleno = 669 (0x29d), region = 32 }
  0x6d   : > { %4118 = dma.done.wait (%p4822_p7), [#allocation3], 128   ;;  %p4823_p9 = pmov %p4822_p7 }
  0x6e   : > { %s196_s8 = sand.u32 1, %s4256_s25   ;;  %s4352_s18 = sand.u32 1, %s4135_s13  }
  0x6f   : > { %4120 = vsyncadd (%p4823_p9), [#allocation3], 4294967168  ;;  %s3466_s23 = smul.u32 2560, %s4352_s18  ;;  %s197_s21 = scalar_lea.sflag [#allocation6], %s196_s8 }
  0x70   : > { %p4824_p10 = scmp.ne.s32.totalorder %s4813_s28, 0 }
  0x71   : > { %s4355_s22 = scalar_lea.vmem [#allocation5], %s3466_s23 }
  0x72   : > { %4122 = dma.done.wait (%p4824_p10), %s197_s21, 41040  }
  0x73   : > { %4124 = vsyncadd (%p4824_p10), %s197_s21, 4294926256  ;;  %v3536_v0 = vld [vmem:[%s4355_s22 + $0x4] ss:$20 sps:$4 sm:$0xff]   ;;  %v3538_v1 = vld [vmem:[%s4355_s22 + $0xc] ss:$20 sps:$4 sm:$0xff]   ;;  %v628_v36 = vlaneseq  ;;  %s3467_s30 = smul.u32 5, %s4352_s18 }
  0x74   : > { %2375 = vmatprep.subr.bf16.mxu0 %v3536_v0  ;;  %v3540_v2 = vld [vmem:[%s4355_s22] ss:$20 sps:$4 sm:$0xff]   ;;  %v3541_v3 = vld [vmem:[%s4355_s22 + $0x8] ss:$20 sps:$4 sm:$0xff]   ;;  %2539 = vmatprep.subr.bf16.mxu1 %v3538_v1  ;;  %v3547_v7 = vld [vmem:[%s4355_s22 + $0x30] ss:$20 sps:$4 sm:$0xff]  }
  0x75   : > { %v3542_v4 = vld [vmem:[%s4355_s22 + $0x2c] ss:$20 sps:$4 sm:$0xff]   ;;  %2376 = vmatpush1.bf16.msra.mxu0 %v3540_v2  ;;  %2540 = vmatpush1.bf16.msra.mxu1 %v3541_v3  ;;  %v3544_v5 = vld [vmem:[%s4355_s22 + $0x34] ss:$20 sps:$4 sm:$0xff]   ;;  %v3550_v9 = vld [vmem:[%s4355_s22 + $0x5c] ss:$20 sps:$4 sm:$0xff]  }
  0x76   : > { %v3546_v6 = vld [vmem:[%s4355_s22 + $0x28] ss:$20 sps:$4 sm:$0xff]   ;;  %2377 = vmatprep.subr.bf16.mxu0 %v3542_v4  ;;  %2541 = vmatprep.subr.bf16.mxu1 %v3544_v5  ;;  %v3552_v10 = vld [vmem:[%s4355_s22 + $0x50] ss:$20 sps:$4 sm:$0xff]   ;;  %v3553_v11 = vld [vmem:[%s4355_s22 + $0x58] ss:$20 sps:$4 sm:$0xff]  }
  0x77   : > { %v3548_v8 = vld [vmem:[%s4355_s22 + $0x54] ss:$20 sps:$4 sm:$0xff]   ;;  %v3554_v12 = vld [vmem:[%s4355_s22 + $0x7c] ss:$20 sps:$4 sm:$0xff]   ;;  %v3556_v13 = vld [vmem:[%s4355_s22 + $0x84] ss:$20 sps:$4 sm:$0xff]  }
  0x78   : > { %v3558_v14 = vld [vmem:[%s4355_s22 + $0x78] ss:$20 sps:$4 sm:$0xff]   ;;  %v3559_v15 = vld [vmem:[%s4355_s22 + $0x80] ss:$20 sps:$4 sm:$0xff]   ;;  %v3565_v19 = vld [vmem:[%s4355_s22 + $0xa8] ss:$20 sps:$4 sm:$0xff]  }
  0x79   : > { %2378 = vmatpush1.bf16.msra.mxu0 %v3546_v6  ;;  %2542 = vmatpush1.bf16.msra.mxu1 %v3547_v7  ;;  %v3560_v16 = vld [vmem:[%s4355_s22 + $0xa4] ss:$20 sps:$4 sm:$0xff]   ;;  %v3562_v17 = vld [vmem:[%s4355_s22 + $0xac] ss:$20 sps:$4 sm:$0xff]   ;;  %v3568_v21 = vld [vmem:[%s4355_s22 + $0xd4] ss:$20 sps:$4 sm:$0xff]  }
  0x7a   : > { %2379 = vmatprep.subr.bf16.mxu0 %v3548_v8  ;;  %2543 = vmatprep.subr.bf16.mxu1 %v3550_v9  ;;  %v3564_v18 = vld [vmem:[%s4355_s22 + $0xa0] ss:$20 sps:$4 sm:$0xff]   ;;  %v3570_v22 = vld [vmem:[%s4355_s22 + $0xc8] ss:$20 sps:$4 sm:$0xff]   ;;  %v3571_v23 = vld [vmem:[%s4355_s22 + $0xd0] ss:$20 sps:$4 sm:$0xff]  }
  0x7b   : > { %v3566_v20 = vld [vmem:[%s4355_s22 + $0xcc] ss:$20 sps:$4 sm:$0xff]   ;;  %v3572_v24 = vld [vmem:[%s4355_s22 + $0xf4] ss:$20 sps:$4 sm:$0xff]   ;;  %v3574_v25 = vld [vmem:[%s4355_s22 + $0xfc] ss:$20 sps:$4 sm:$0xff]  }
  0x7c   : > { %v3576_v26 = vld [vmem:[%s4355_s22 + $0xf0] ss:$20 sps:$4 sm:$0xff]   ;;  %v3577_v27 = vld [vmem:[%s4355_s22 + $0xf8] ss:$20 sps:$4 sm:$0xff]   ;;  %v3583_v31 = vld [vmem:[%s4355_s22 + $0x120] ss:$20 sps:$4 sm:$0xff]  }
  0x7d   : > { %2380 = vmatpush1.bf16.msra.mxu0 %v3552_v10  ;;  %2544 = vmatpush1.bf16.msra.mxu1 %v3553_v11  ;;  %v3578_v28 = vld [vmem:[%s4355_s22 + $0x11c] ss:$20 sps:$4 sm:$0xff]   ;;  %v3580_v29 = vld [vmem:[%s4355_s22 + $0x124] ss:$20 sps:$4 sm:$0xff]   ;;  %v3586_v33 = vld [vmem:[%s4355_s22 + $0x14c] ss:$20 sps:$4 sm:$0xff]  }
  0x7e   : > { %2381 = vmatprep.subr.bf16.mxu0 %v3554_v12  ;;  %2545 = vmatprep.subr.bf16.mxu1 %v3556_v13  ;;  %v3582_v30 = vld [vmem:[%s4355_s22 + $0x118] ss:$20 sps:$4 sm:$0xff]   ;;  %v3588_v34 = vld [vmem:[%s4355_s22 + $0x140] ss:$20 sps:$4 sm:$0xff]   ;;  %v3589_v35 = vld [vmem:[%s4355_s22 + $0x148] ss:$20 sps:$4 sm:$0xff]  }
  0x7f   : > { %v3584_v32 = vld [vmem:[%s4355_s22 + $0x144] ss:$20 sps:$4 sm:$0xff]   ;;  %v4151_v37 = vmov 1966171168   ;;  %v3590_v39 = vld [vmem:[%s4355_s22 + $0x16c] ss:$20 sps:$4 sm:$0xff]  }
  0x80   : > { %v656_v38 = vunpack.c.l.s4 %v4151_v37  ;;  %v3592_v40 = vld [vmem:[%s4355_s22 + $0x174] ss:$20 sps:$4 sm:$0xff]   ;;  %v4400_v42 = vshrl.u32 %v628_v36, 7  ;;  %v3595_v44 = vld [vmem:[%s4355_s22 + $0x170] ss:$20 sps:$4 sm:$0xff]   ;;  %v241_v52 = vld [vmem:[#allocation2] sm:$0xff] }
  0x81   : > { %2382 = vmatpush1.bf16.msra.mxu0 %v3558_v14  ;;  %2546 = vmatpush1.bf16.msra.mxu1 %v3559_v15  ;;  %v3594_v41 = vld [vmem:[%s4355_s22 + $0x168] ss:$20 sps:$4 sm:$0xff]   ;;  %v3600_v47 = vld [vmem:[%s4355_s22 + $0x190] ss:$20 sps:$4 sm:$0xff]   ;;  %v3601_v48 = vld [vmem:[%s4355_s22 + $0x198] ss:$20 sps:$4 sm:$0xff]   ;;  %v654_v9 = vcombine.high %v241_v52, %v241_v52 }
  0x82   : > { %2383 = vmatprep.subr.bf16.mxu0 %v3560_v16  ;;  %2547 = vmatprep.subr.bf16.mxu1 %v3562_v17  ;;  %v657_v43 = vunpack.c.0.s8 %v656_v38  ;;  %v3596_v45 = vld [vmem:[%s4355_s22 + $0x194] ss:$20 sps:$4 sm:$0xff]   ;;  %v3598_v46 = vld [vmem:[%s4355_s22 + $0x19c] ss:$20 sps:$4 sm:$0xff]   ;;  %v3604_v51 = vld [vmem:[%s4355_s22 + $0x1c4] ss:$20 sps:$4 sm:$0xff]  }
  0x83   : > { %v3602_v50 = vld [vmem:[%s4355_s22 + $0x1bc] ss:$20 sps:$4 sm:$0xff]   ;;  %v3606_v53 = vld [vmem:[%s4355_s22 + $0x1b8] ss:$20 sps:$4 sm:$0xff]   ;;  %v3607_v55 = vld [vmem:[%s4355_s22 + $0x1c0] ss:$20 sps:$4 sm:$0xff]  }
  0x84   : > { %v4408_v49 = vsub.s32 %v657_v43, %v4400_v42  ;;  %v3608_v56 = vld [vmem:[%s4355_s22 + $0x1e4] ss:$20 sps:$4 sm:$0xff]   ;;  %v3610_v57 = vld [vmem:[%s4355_s22 + $0x1ec] ss:$20 sps:$4 sm:$0xff]   ;;  %v3613_v61 = vld [vmem:[%s4355_s22 + $0x1e8] ss:$20 sps:$4 sm:$0xff]  }
  0x85   : > { %2384 = vmatpush1.bf16.msra.mxu0 %v3564_v18  ;;  %2548 = vmatpush1.bf16.msra.mxu1 %v3565_v19  ;;  %v3612_v59 = vld [vmem:[%s4355_s22 + $0x1e0] ss:$20 sps:$4 sm:$0xff]   ;;  %v3618_v0 = vld [vmem:[%s4355_s22 + $0x208] ss:$20 sps:$4 sm:$0xff]   ;;  %v3619_v1 = vld [vmem:[%s4355_s22 + $0x210] ss:$20 sps:$4 sm:$0xff]  }
  0x86   : > { %2385 = vmatprep.subr.bf16.mxu0 %v3566_v20  ;;  %2549 = vmatprep.subr.bf16.mxu1 %v3568_v21  ;;  %v661_v54 = vrot.slane %v241_v52, %v4408_v49  ;;  %v3614_v62 = vld [vmem:[%s4355_s22 + $0x20c] ss:$20 sps:$4 sm:$0xff]   ;;  %v3616_v63 = vld [vmem:[%s4355_s22 + $0x214] ss:$20 sps:$4 sm:$0xff]   ;;  %v3622_v3 = vld [vmem:[%s4355_s22 + $0x23c] ss:$20 sps:$4 sm:$0xff]   ;;  %v668_v13 = vrot.slane %v654_v9, %v4408_v49 }
  0x87   : > { %v3620_v2 = vld [vmem:[%s4355_s22 + $0x234] ss:$20 sps:$4 sm:$0xff]   ;;  %v3624_v4 = vld [vmem:[%s4355_s22 + $0x230] ss:$20 sps:$4 sm:$0xff]   ;;  %v3625_v5 = vld [vmem:[%s4355_s22 + $0x238] ss:$20 sps:$4 sm:$0xff]  }
  0x88   : > { %v669_v58 = vcombine.high %v661_v54, %v661_v54  ;;  %v3626_v6 = vld [vmem:[%s4355_s22 + $0x25c] ss:$20 sps:$4 sm:$0xff]   ;;  %v3628_v7 = vld [vmem:[%s4355_s22 + $0x264] ss:$20 sps:$4 sm:$0xff]   ;;  %v3631_v10 = vld [vmem:[%s4355_s22 + $0x260] ss:$20 sps:$4 sm:$0xff]   ;;  %v4441_v15 = vrot.slane %v661_v54, %v4408_v49  ;;  %v670_v16 = vcombine.high %v668_v13, %v668_v13  ;;  %v4450_v21 = vrot.slane %v668_v13, %v4408_v49 }
  0x89   : > { %2386 = vmatpush1.bf16.msra.mxu0 %v3570_v22  ;;  %2550 = vmatpush1.bf16.msra.mxu1 %v3571_v23  ;;  %v3630_v8 = vld [vmem:[%s4355_s22 + $0x258] ss:$20 sps:$4 sm:$0xff]   ;;  %v3632_v14 = vld [vmem:[%s4355_s22 + $0x280] ss:$20 sps:$4 sm:$0xff]   ;;  %v3635_v17 = vld [vmem:[%s4355_s22 + $0x288] ss:$20 sps:$4 sm:$0xff]  }
  0x8a   : > { %2387 = vmatprep.subr.bf16.mxu0 %v3572_v24  ;;  %2551 = vmatprep.subr.bf16.mxu1 %v3574_v25  ;;  %v4419_v60 = vrot.slane %v669_v58, %v4408_v49  ;;  %v3634_v11 = vld [vmem:[%s4355_s22 + $0x284] ss:$20 sps:$4 sm:$0xff]   ;;  %v3637_v12 = vld [vmem:[%s4355_s22 + $0x28c] ss:$20 sps:$4 sm:$0xff]   ;;  %v3643_v19 = vld [vmem:[%s4355_s22 + $0x2b4] ss:$20 sps:$4 sm:$0xff]   ;;  %v4447_v20 = vrot.slane %v670_v16, %v4408_v49 }
  0x8b   : > { %v3640_v18 = vld [vmem:[%s4355_s22 + $0x2ac] ss:$20 sps:$4 sm:$0xff]   ;;  %v3638_v23 = vld [vmem:[%s4355_s22 + $0x2a8] ss:$20 sps:$4 sm:$0xff]   ;;  %v3641_v24 = vld [vmem:[%s4355_s22 + $0x2b0] ss:$20 sps:$4 sm:$0xff]  }
  0x8c   : > { %2407 = vmatprep.mubr.bf16.mxu0 %v4419_v60  ;;  %2571 = vmatprep.mubr.bf16.mxu1 %v4419_v60  ;;  %v4454_v22 = vcombine.high %v4419_v60, %v4419_v60  ;;  %v3646_v25 = vld [vmem:[%s4355_s22 + $0x2d4] ss:$20 sps:$4 sm:$0xff]   ;;  %v3664_v37 = vld [vmem:[%s4355_s22 + $0x34c] ss:$20 sps:$4 sm:$0xff]   ;;  %v3673_v43 = vld [vmem:[%s4355_s22 + $0x37c] ss:$20 sps:$4 sm:$0xff]  }
  0x8d   : > { %2388 = vmatpush1.bf16.msra.mxu0 %v3576_v26  ;;  %2552 = vmatpush1.bf16.msra.mxu1 %v3577_v27  ;;  %v3649_v26 = vld [vmem:[%s4355_s22 + $0x2dc] ss:$20 sps:$4 sm:$0xff]   ;;  %v3667_v38 = vld [vmem:[%s4355_s22 + $0x354] ss:$20 sps:$4 sm:$0xff]   ;;  %v3688_v54 = vld [vmem:[%s4355_s22 + $0x3ec] ss:$20 sps:$4 sm:$0xff]  }
  0x8e   : > { %2389 = vmatprep.subr.bf16.mxu0 %v3578_v28  ;;  %2553 = vmatprep.subr.bf16.mxu1 %v3580_v29  ;;  %v3644_v27 = vld [vmem:[%s4355_s22 + $0x2d0] ss:$20 sps:$4 sm:$0xff]   ;;  %v3647_v28 = vld [vmem:[%s4355_s22 + $0x2d8] ss:$20 sps:$4 sm:$0xff]   ;;  %v3659_v36 = vld [vmem:[%s4355_s22 + $0x328] ss:$20 sps:$4 sm:$0xff]  }
  0x8f   : > { %v3652_v29 = vld [vmem:[%s4355_s22 + $0x2fc] ss:$20 sps:$4 sm:$0xff]   ;;  %v3677_v49 = vld [vmem:[%s4355_s22 + $0x3a0] ss:$20 sps:$4 sm:$0xff]   ;;  %s209_s28 = scalar_lea.vmem [#allocation7], %s3467_s30  ;;  %s3468_s4 = smul.u32 10, %s4352_s18 }
  0x90   : > { %v3680_v52 = vld [vmem:[%s4355_s22 + $0x3c0] ss:$20 sps:$4 sm:$0xff]   ;;  %v3710_v9 = vld [vmem:[%s4355_s22 + $0x488] ss:$20 sps:$4 sm:$0xff]   ;;  %v3716_v13 = vld [vmem:[%s4355_s22 + $0x4b0] ss:$20 sps:$4 sm:$0xff]  }
  0x91   : > { %2390 = vmatpush1.bf16.msra.mxu0 %v3582_v30  ;;  %2554 = vmatpush1.bf16.msra.mxu1 %v3583_v31  ;;  %v3655_v30 = vld [vmem:[%s4355_s22 + $0x304] ss:$20 sps:$4 sm:$0xff]   ;;  %v3694_v58 = vld [vmem:[%s4355_s22 + $0x414] ss:$20 sps:$4 sm:$0xff]   ;;  %v3724_v16 = vld [vmem:[%s4355_s22 + $0x4dc] ss:$20 sps:$4 sm:$0xff]  }
  0x92   : > { %2391 = vmatprep.subr.bf16.mxu0 %v3584_v32  ;;  %2555 = vmatprep.subr.bf16.mxu1 %v3586_v33  ;;  %v3650_v31 = vld [vmem:[%s4355_s22 + $0x2f8] ss:$20 sps:$4 sm:$0xff]   ;;  %v3653_v32 = vld [vmem:[%s4355_s22 + $0x300] ss:$20 sps:$4 sm:$0xff]   ;;  %s4747_s17 = scalar_lea.vmem [#allocation8], %s3468_s4  ;;  %s3347_s20 = smul.u32 160, %s4256_s25 }
  0x93   : > { %v3658_v33 = vld [vmem:[%s4355_s22 + $0x324] ss:$20 sps:$4 sm:$0xff]   ;;  %s2911_s24 = sshll.u32 %s4747_s17, 4  ;;  %s2897_s6 = scalar_lea.sflag [#allocation4], %s4352_s18  ;;  %s4758_s24 = int_to_ptr.vmem [resolvable:$true] %s2911_s24 }
  0x94   : > { %s4756_s5 = scalar_lea.hbm %s4804_s3, %s3347_s20  ;;  %s4073_s10 = scalar_lea.vmem %s4758_s24, 160 }
  0x95   : > { %2392 = vmatpush1.bf16.msra.mxu0 %v3588_v34  ;;  %2556 = vmatpush1.bf16.msra.mxu1 %v3589_v35  ;;  %v3661_v34 = vld [vmem:[%s4355_s22 + $0x32c] ss:$20 sps:$4 sm:$0xff]   ;;  %p4074_p12 = scmp.ne.s32.totalorder %s4758_s24, %s4073_s10  ;;  %p4825_p4 = scmp.ne.s32.totalorder %s4814_s27, 0 }
  0x96   : > { %2393 = vmatprep.subr.bf16.mxu0 %v3590_v39  ;;  %2557 = vmatprep.subr.bf16.mxu1 %v3592_v40  ;;  %v3656_v35 = vld [vmem:[%s4355_s22 + $0x320] ss:$20 sps:$4 sm:$0xff]   ;;  %v3662_v39 = vld [vmem:[%s4355_s22 + $0x348] ss:$20 sps:$4 sm:$0xff]   ;;  %v3665_v40 = vld [vmem:[%s4355_s22 + $0x350] ss:$20 sps:$4 sm:$0xff]  }
  0x97   : > { %p4075_p0 = pnand %p4074_p12, %p4825_p4  ;;  %s4153_s25 = smov [#allocation8]  }
  0x98   : > { %s4077_s11 = sshll.u32 %s4153_s25, 4  ;;  %s4078_s11 = int_to_ptr.vmem [resolvable:$false] %s4077_s11 }
  0x99   : > { %2394 = vmatpush1.bf16.msra.mxu0 %v3594_v41  ;;  %2558 = vmatpush1.bf16.msra.mxu1 %v3595_v44  ;;  %v3670_v41 = vld [vmem:[%s4355_s22 + $0x374] ss:$20 sps:$4 sm:$0xff]   ;;  %v3668_v44 = vld [vmem:[%s4355_s22 + $0x370] ss:$20 sps:$4 sm:$0xff]   ;;  %p4076_p11 = pneg %p4075_p0  ;;  %s4079_s7 = scalar_lea.vmem %s4078_s11, 320 }
  0x9a   : > { %2395 = vmatprep.subr.bf16.mxu0 %v3596_v45  ;;  %2559 = vmatprep.subr.bf16.mxu1 %v3598_v46  ;;  %v3671_v45 = vld [vmem:[%s4355_s22 + $0x378] ss:$20 sps:$4 sm:$0xff]   ;;  %v3676_v46 = vld [vmem:[%s4355_s22 + $0x39c] ss:$20 sps:$4 sm:$0xff]   ;;  %p4080_p13 = scmp.lt.s32.totalorder %s4758_s24, %s4078_s11  ;;  %p4081_p3 = scmp.lt.s32.totalorder %s4079_s7, %s4073_s10 }
  0x9c   : > { %p4082_p8 = por %p4081_p3, %p4080_p13 }
  0x9d   : > { %2396 = vmatpush1.bf16.msra.mxu0 %v3600_v47  ;;  %2560 = vmatpush1.bf16.msra.mxu1 %v3601_v48  ;;  %v3679_v47 = vld [vmem:[%s4355_s22 + $0x3a4] ss:$20 sps:$4 sm:$0xff]  }
  0x9e   : > { %2397 = vmatprep.subr.bf16.mxu0 %v3602_v50  ;;  %2561 = vmatprep.subr.bf16.mxu1 %v3604_v51  ;;  %v3674_v48 = vld [vmem:[%s4355_s22 + $0x398] ss:$20 sps:$4 sm:$0xff]   ;;  %p4083_p1 = pnand %p4082_p8, %p4076_p11 }
  0x9f   : > { %v3682_v50 = vld [vmem:[%s4355_s22 + $0x3c4] ss:$20 sps:$4 sm:$0xff]   ;;  %v3685_v51 = vld [vmem:[%s4355_s22 + $0x3cc] ss:$20 sps:$4 sm:$0xff]  }
  0xa1   : > { %2398 = vmatpush1.bf16.msra.mxu0 %v3606_v53  ;;  %2562 = vmatpush1.bf16.msra.mxu1 %v3607_v55  ;;  %v3683_v53 = vld [vmem:[%s4355_s22 + $0x3c8] ss:$20 sps:$4 sm:$0xff]  }
  0xa2   : > { %2399 = vmatprep.subr.bf16.mxu0 %v3608_v56  ;;  %2563 = vmatprep.subr.bf16.mxu1 %v3610_v57  ;;  %v3691_v55 = vld [vmem:[%s4355_s22 + $0x3f4] ss:$20 sps:$4 sm:$0xff]   ;;  %v3689_v57 = vld [vmem:[%s4355_s22 + $0x3f0] ss:$20 sps:$4 sm:$0xff]  }
  0xa3   : > { %v3686_v56 = vld [vmem:[%s4355_s22 + $0x3e8] ss:$20 sps:$4 sm:$0xff]  }
  0xa5   : > { %2400 = vmatpush1.bf16.msra.mxu0 %v3612_v59  ;;  %2564 = vmatpush1.bf16.msra.mxu1 %v3613_v61  ;;  %v3697_v59 = vld [vmem:[%s4355_s22 + $0x41c] ss:$20 sps:$4 sm:$0xff]  }
  0xa6   : > { %2401 = vmatprep.subr.bf16.mxu0 %v3614_v62  ;;  %2565 = vmatprep.subr.bf16.mxu1 %v3616_v63  ;;  %v3692_v61 = vld [vmem:[%s4355_s22 + $0x410] ss:$20 sps:$4 sm:$0xff]   ;;  %v3695_v62 = vld [vmem:[%s4355_s22 + $0x418] ss:$20 sps:$4 sm:$0xff]  }
  0xa7   : > { %v3700_v63 = vld [vmem:[%s4355_s22 + $0x43c] ss:$20 sps:$4 sm:$0xff]  }
  0xa9   : > { %2402 = vmatpush1.bf16.msra.mxu0 %v3618_v0  ;;  %2566 = vmatpush1.bf16.msra.mxu1 %v3619_v1  ;;  %v3703_v0 = vld [vmem:[%s4355_s22 + $0x444] ss:$20 sps:$4 sm:$0xff]  }
  0xaa   : > { %2403 = vmatprep.subr.bf16.mxu0 %v3620_v2  ;;  %2567 = vmatprep.subr.bf16.mxu1 %v3622_v3  ;;  %v3698_v1 = vld [vmem:[%s4355_s22 + $0x438] ss:$20 sps:$4 sm:$0xff]   ;;  %v3701_v2 = vld [vmem:[%s4355_s22 + $0x440] ss:$20 sps:$4 sm:$0xff]  }
  0xab   : > { %v3706_v3 = vld [vmem:[%s4355_s22 + $0x464] ss:$20 sps:$4 sm:$0xff]  }
  0xad   : > { %2404 = vmatpush1.bf16.msra.mxu0 %v3624_v4  ;;  %2568 = vmatpush1.bf16.msra.mxu1 %v3625_v5  ;;  %v3709_v4 = vld [vmem:[%s4355_s22 + $0x46c] ss:$20 sps:$4 sm:$0xff]  }
  0xae   : > { %2405 = vmatprep.subr.bf16.mxu0 %v3626_v6  ;;  %2569 = vmatprep.subr.bf16.mxu1 %v3628_v7  ;;  %v3704_v5 = vld [vmem:[%s4355_s22 + $0x460] ss:$20 sps:$4 sm:$0xff]   ;;  %v3707_v6 = vld [vmem:[%s4355_s22 + $0x468] ss:$20 sps:$4 sm:$0xff]  }
  0xaf   : > { %v3712_v7 = vld [vmem:[%s4355_s22 + $0x48c] ss:$20 sps:$4 sm:$0xff]  }
  0xb1   : > { %2406 = vmatpush1.bf16.msra.mxu0 %v3630_v8  ;;  %2570 = vmatpush1.bf16.msra.mxu1 %v3631_v10  ;;  %v3715_v8 = vld [vmem:[%s4355_s22 + $0x494] ss:$20 sps:$4 sm:$0xff]   ;;  %v3713_v10 = vld [vmem:[%s4355_s22 + $0x490] ss:$20 sps:$4 sm:$0xff]  }
  0xb2   : > { %2416 = vmatprep.subr.bf16.mxu0 %v3634_v11  ;;  %2580 = vmatprep.subr.bf16.mxu1 %v3637_v12  ;;  %v3718_v11 = vld [vmem:[%s4355_s22 + $0x4b4] ss:$20 sps:$4 sm:$0xff]   ;;  %v3721_v12 = vld [vmem:[%s4355_s22 + $0x4bc] ss:$20 sps:$4 sm:$0xff]  }
  0xb4   : > { %2408 = vmatmul.mubr.bf16.vlgmr.msra.gmra.mrb[0].mxu0 %v4441_v15  ;;  %2572 = vmatmul.mubr.bf16.vlgmr.msra.gmra.mrb[0].mxu1 %v4441_v15 }
  0xb5   : > { %2417 = vmatpush1.bf16.msra.mxu0 %v3632_v14  ;;  %2581 = vmatpush1.bf16.msra.mxu1 %v3635_v17  ;;  %v3719_v14 = vld [vmem:[%s4355_s22 + $0x4b8] ss:$20 sps:$4 sm:$0xff]  }
  0xb6   : > { %2418 = vmatprep.subr.bf16.mxu0 %v3640_v18  ;;  %2582 = vmatprep.subr.bf16.mxu1 %v3643_v19  ;;  %v3727_v17 = vld [vmem:[%s4355_s22 + $0x4e4] ss:$20 sps:$4 sm:$0xff]   ;;  %v3725_v19 = vld [vmem:[%s4355_s22 + $0x4e0] ss:$20 sps:$4 sm:$0xff]  }
  0xb7   : > { %2448 = vmatprep.mubr.bf16.mxu0 %v4454_v22  ;;  %2612 = vmatprep.mubr.bf16.mxu1 %v4454_v22  ;;  %v3722_v18 = vld [vmem:[%s4355_s22 + $0x4d8] ss:$20 sps:$4 sm:$0xff]  }
  0xb9   : > { %2419 = vmatpush1.bf16.msra.mxu0 %v3638_v23  ;;  %2583 = vmatpush1.bf16.msra.mxu1 %v3641_v24  ;;  %v3730_v23 = vld [vmem:[%s4355_s22 + $0x504] ss:$20 sps:$4 sm:$0xff]   ;;  %v3733_v24 = vld [vmem:[%s4355_s22 + $0x50c] ss:$20 sps:$4 sm:$0xff]  }
  0xba   : > { %2420 = vmatprep.subr.bf16.mxu0 %v3646_v25  ;;  %2584 = vmatprep.subr.bf16.mxu1 %v3649_v26  ;;  %v3728_v25 = vld [vmem:[%s4355_s22 + $0x500] ss:$20 sps:$4 sm:$0xff]   ;;  %v4523_v26 = vcombine.high %v4441_v15, %v4441_v15 }
  0xbd   : > { %2421 = vmatpush1.bf16.msra.mxu0 %v3644_v27  ;;  %2585 = vmatpush1.bf16.msra.mxu1 %v3647_v28  ;;  %v3731_v27 = vld [vmem:[%s4355_s22 + $0x508] ss:$20 sps:$4 sm:$0xff]   ;;  %v3736_v28 = vld [vmem:[%s4355_s22 + $0x52c] ss:$20 sps:$4 sm:$0xff]  }
  0xbe   : > { %2422 = vmatprep.subr.bf16.mxu0 %v3652_v29  ;;  %2586 = vmatprep.subr.bf16.mxu1 %v3655_v30  ;;  %v3739_v29 = vld [vmem:[%s4355_s22 + $0x534] ss:$20 sps:$4 sm:$0xff]  }
  0xbf   : > { %v3734_v30 = vld [vmem:[%s4355_s22 + $0x528] ss:$20 sps:$4 sm:$0xff]  }
  0xc1   : > { %2423 = vmatpush1.bf16.msra.mxu0 %v3650_v31  ;;  %2587 = vmatpush1.bf16.msra.mxu1 %v3653_v32  ;;  %v3737_v31 = vld [vmem:[%s4355_s22 + $0x530] ss:$20 sps:$4 sm:$0xff]   ;;  %v3742_v32 = vld [vmem:[%s4355_s22 + $0x554] ss:$20 sps:$4 sm:$0xff]  }
  0xc2   : > { %2424 = vmatprep.subr.bf16.mxu0 %v3658_v33  ;;  %2588 = vmatprep.subr.bf16.mxu1 %v3661_v34  ;;  %v3745_v33 = vld [vmem:[%s4355_s22 + $0x55c] ss:$20 sps:$4 sm:$0xff]  }
  0xc3   : > { %v3740_v34 = vld [vmem:[%s4355_s22 + $0x550] ss:$20 sps:$4 sm:$0xff]  }
  0xc5   : > { %2425 = vmatpush1.bf16.msra.mxu0 %v3656_v35  ;;  %2589 = vmatpush1.bf16.msra.mxu1 %v3659_v36  ;;  %v3743_v35 = vld [vmem:[%s4355_s22 + $0x558] ss:$20 sps:$4 sm:$0xff]   ;;  %v3748_v36 = vld [vmem:[%s4355_s22 + $0x57c] ss:$20 sps:$4 sm:$0xff]  }
  0xc6   : > { %2426 = vmatprep.subr.bf16.mxu0 %v3664_v37  ;;  %2590 = vmatprep.subr.bf16.mxu1 %v3667_v38  ;;  %v3751_v37 = vld [vmem:[%s4355_s22 + $0x584] ss:$20 sps:$4 sm:$0xff]  }
  0xc7   : > { %v3746_v38 = vld [vmem:[%s4355_s22 + $0x578] ss:$20 sps:$4 sm:$0xff]  }
  0xc9   : > { %2427 = vmatpush1.bf16.msra.mxu0 %v3662_v39  ;;  %2591 = vmatpush1.bf16.msra.mxu1 %v3665_v40  ;;  %v3749_v39 = vld [vmem:[%s4355_s22 + $0x580] ss:$20 sps:$4 sm:$0xff]   ;;  %v3754_v40 = vld [vmem:[%s4355_s22 + $0x5a4] ss:$20 sps:$4 sm:$0xff]  }
  0xca   : > { %2428 = vmatprep.subr.bf16.mxu0 %v3670_v41  ;;  %2592 = vmatprep.subr.bf16.mxu1 %v3673_v43  ;;  %v3757_v41 = vld [vmem:[%s4355_s22 + $0x5ac] ss:$20 sps:$4 sm:$0xff]  }
  0xcb   : > { %v3752_v43 = vld [vmem:[%s4355_s22 + $0x5a0] ss:$20 sps:$4 sm:$0xff]  }
  0xcd   : > { %2429 = vmatpush1.bf16.msra.mxu0 %v3668_v44  ;;  %2593 = vmatpush1.bf16.msra.mxu1 %v3671_v45  ;;  %v3755_v44 = vld [vmem:[%s4355_s22 + $0x5a8] ss:$20 sps:$4 sm:$0xff]   ;;  %v3760_v45 = vld [vmem:[%s4355_s22 + $0x5cc] ss:$20 sps:$4 sm:$0xff]  }
  0xce   : > { %2430 = vmatprep.subr.bf16.mxu0 %v3676_v46  ;;  %2594 = vmatprep.subr.bf16.mxu1 %v3679_v47  ;;  %v3763_v46 = vld [vmem:[%s4355_s22 + $0x5d4] ss:$20 sps:$4 sm:$0xff]  }
  0xcf   : > { %v3758_v47 = vld [vmem:[%s4355_s22 + $0x5c8] ss:$20 sps:$4 sm:$0xff]  }
  0xd1   : > { %2431 = vmatpush1.bf16.msra.mxu0 %v3674_v48  ;;  %2595 = vmatpush1.bf16.msra.mxu1 %v3677_v49  ;;  %v3761_v48 = vld [vmem:[%s4355_s22 + $0x5d0] ss:$20 sps:$4 sm:$0xff]   ;;  %v3766_v49 = vld [vmem:[%s4355_s22 + $0x5f4] ss:$20 sps:$4 sm:$0xff]  }
  0xd2   : > { %2432 = vmatprep.subr.bf16.mxu0 %v3682_v50  ;;  %2596 = vmatprep.subr.bf16.mxu1 %v3685_v51  ;;  %v3769_v50 = vld [vmem:[%s4355_s22 + $0x5fc] ss:$20 sps:$4 sm:$0xff]  }
  0xd3   : > { %v3764_v51 = vld [vmem:[%s4355_s22 + $0x5f0] ss:$20 sps:$4 sm:$0xff]  }
  0xd5   : > { %2433 = vmatpush1.bf16.msra.mxu0 %v3680_v52  ;;  %2597 = vmatpush1.bf16.msra.mxu1 %v3683_v53  ;;  %v3767_v52 = vld [vmem:[%s4355_s22 + $0x5f8] ss:$20 sps:$4 sm:$0xff]   ;;  %v3772_v53 = vld [vmem:[%s4355_s22 + $0x61c] ss:$20 sps:$4 sm:$0xff]  }
  0xd6   : > { %2434 = vmatprep.subr.bf16.mxu0 %v3688_v54  ;;  %2598 = vmatprep.subr.bf16.mxu1 %v3691_v55  ;;  %v3775_v54 = vld [vmem:[%s4355_s22 + $0x624] ss:$20 sps:$4 sm:$0xff]  }
  0xd7   : > { %v3770_v55 = vld [vmem:[%s4355_s22 + $0x618] ss:$20 sps:$4 sm:$0xff]  }
  0xd9   : > { %2435 = vmatpush1.bf16.msra.mxu0 %v3686_v56  ;;  %2599 = vmatpush1.bf16.msra.mxu1 %v3689_v57  ;;  %v3773_v56 = vld [vmem:[%s4355_s22 + $0x620] ss:$20 sps:$4 sm:$0xff]   ;;  %v3778_v57 = vld [vmem:[%s4355_s22 + $0x644] ss:$20 sps:$4 sm:$0xff]  }
  0xda   : > { %2436 = vmatprep.subr.bf16.mxu0 %v3694_v58  ;;  %2600 = vmatprep.subr.bf16.mxu1 %v3697_v59  ;;  %v3781_v58 = vld [vmem:[%s4355_s22 + $0x64c] ss:$20 sps:$4 sm:$0xff]  }
  0xdb   : > { %v3776_v59 = vld [vmem:[%s4355_s22 + $0x640] ss:$20 sps:$4 sm:$0xff]  }
  0xdd   : > { %2437 = vmatpush1.bf16.msra.mxu0 %v3692_v61  ;;  %2601 = vmatpush1.bf16.msra.mxu1 %v3695_v62  ;;  %v3779_v61 = vld [vmem:[%s4355_s22 + $0x648] ss:$20 sps:$4 sm:$0xff]   ;;  %v3784_v62 = vld [vmem:[%s4355_s22 + $0x66c] ss:$20 sps:$4 sm:$0xff]  }
  0xde   : > { %2438 = vmatprep.subr.bf16.mxu0 %v3700_v63  ;;  %2602 = vmatprep.subr.bf16.mxu1 %v3703_v0  ;;  %v3787_v63 = vld [vmem:[%s4355_s22 + $0x674] ss:$20 sps:$4 sm:$0xff]  }
  0xdf   : > { %v3782_v0 = vld [vmem:[%s4355_s22 + $0x668] ss:$20 sps:$4 sm:$0xff]  }
  0xe1   : > { %2439 = vmatpush1.bf16.msra.mxu0 %v3698_v1  ;;  %2603 = vmatpush1.bf16.msra.mxu1 %v3701_v2  ;;  %v3785_v1 = vld [vmem:[%s4355_s22 + $0x670] ss:$20 sps:$4 sm:$0xff]   ;;  %v3790_v2 = vld [vmem:[%s4355_s22 + $0x694] ss:$20 sps:$4 sm:$0xff]  }
  0xe2   : > { %2440 = vmatprep.subr.bf16.mxu0 %v3706_v3  ;;  %2604 = vmatprep.subr.bf16.mxu1 %v3709_v4  ;;  %v3793_v3 = vld [vmem:[%s4355_s22 + $0x69c] ss:$20 sps:$4 sm:$0xff]  }
  0xe3   : > { %v3788_v4 = vld [vmem:[%s4355_s22 + $0x690] ss:$20 sps:$4 sm:$0xff]  }
  0xe5   : > { %2441 = vmatpush1.bf16.msra.mxu0 %v3704_v5  ;;  %2605 = vmatpush1.bf16.msra.mxu1 %v3707_v6  ;;  %v3791_v5 = vld [vmem:[%s4355_s22 + $0x698] ss:$20 sps:$4 sm:$0xff]   ;;  %v3796_v6 = vld [vmem:[%s4355_s22 + $0x6bc] ss:$20 sps:$4 sm:$0xff]  }
  0xe6   : > { %2442 = vmatprep.subr.bf16.mxu0 %v3712_v7  ;;  %2606 = vmatprep.subr.bf16.mxu1 %v3715_v8  ;;  %v3799_v7 = vld [vmem:[%s4355_s22 + $0x6c4] ss:$20 sps:$4 sm:$0xff]  }
  0xe7   : > { %v3794_v8 = vld [vmem:[%s4355_s22 + $0x6b8] ss:$20 sps:$4 sm:$0xff]  }
  0xe9   : > { %2443 = vmatpush1.bf16.msra.mxu0 %v3710_v9  ;;  %2607 = vmatpush1.bf16.msra.mxu1 %v3713_v10  ;;  %v3797_v9 = vld [vmem:[%s4355_s22 + $0x6c0] ss:$20 sps:$4 sm:$0xff]   ;;  %v3802_v10 = vld [vmem:[%s4355_s22 + $0x6e4] ss:$20 sps:$4 sm:$0xff]  }
  0xea   : > { %2444 = vmatprep.subr.bf16.mxu0 %v3718_v11  ;;  %2608 = vmatprep.subr.bf16.mxu1 %v3721_v12  ;;  %v3805_v11 = vld [vmem:[%s4355_s22 + $0x6ec] ss:$20 sps:$4 sm:$0xff]  }
  0xeb   : > { %v3800_v12 = vld [vmem:[%s4355_s22 + $0x6e0] ss:$20 sps:$4 sm:$0xff]  }
  0xed   : > { %2445 = vmatpush1.bf16.msra.mxu0 %v3716_v13  ;;  %2609 = vmatpush1.bf16.msra.mxu1 %v3719_v14  ;;  %v3803_v13 = vld [vmem:[%s4355_s22 + $0x6e8] ss:$20 sps:$4 sm:$0xff]   ;;  %v3808_v14 = vld [vmem:[%s4355_s22 + $0x70c] ss:$20 sps:$4 sm:$0xff]  }
  0xee   : > { %2446 = vmatprep.subr.bf16.mxu0 %v3724_v16  ;;  %2610 = vmatprep.subr.bf16.mxu1 %v3727_v17  ;;  %v3811_v16 = vld [vmem:[%s4355_s22 + $0x714] ss:$20 sps:$4 sm:$0xff]  }
  0xef   : > { %v3806_v17 = vld [vmem:[%s4355_s22 + $0x708] ss:$20 sps:$4 sm:$0xff]  }
  0xf1   : > { %2447 = vmatpush1.bf16.msra.mxu0 %v3722_v18  ;;  %2611 = vmatpush1.bf16.msra.mxu1 %v3725_v19  ;;  %v3809_v18 = vld [vmem:[%s4355_s22 + $0x710] ss:$20 sps:$4 sm:$0xff]   ;;  %v3814_v19 = vld [vmem:[%s4355_s22 + $0x734] ss:$20 sps:$4 sm:$0xff]  }
  0xf2   : > { %2457 = vmatprep.subr.bf16.mxu0 %v3730_v23  ;;  %2621 = vmatprep.subr.bf16.mxu1 %v3733_v24  ;;  %v3817_v23 = vld [vmem:[%s4355_s22 + $0x73c] ss:$20 sps:$4 sm:$0xff]  }
  0xf3   : > { %v3812_v24 = vld [vmem:[%s4355_s22 + $0x730] ss:$20 sps:$4 sm:$0xff]  }
  0xf4   : > { %2449 = vmatmul.mubr.bf16.vlgmr.msra.gmra.mrb[0].mxu0 %v4523_v26  ;;  %2613 = vmatmul.mubr.bf16.vlgmr.msra.gmra.mrb[0].mxu1 %v4523_v26 }
  0xf5   : > { %2458 = vmatpush1.bf16.msra.mxu0 %v3728_v25  ;;  %2622 = vmatpush1.bf16.msra.mxu1 %v3731_v27  ;;  %v3815_v25 = vld [vmem:[%s4355_s22 + $0x738] ss:$20 sps:$4 sm:$0xff]   ;;  %v3820_v27 = vld [vmem:[%s4355_s22 + $0x75c] ss:$20 sps:$4 sm:$0xff]  }
  0xf6   : > { %2459 = vmatprep.subr.bf16.mxu0 %v3736_v28  ;;  %2623 = vmatprep.subr.bf16.mxu1 %v3739_v29  ;;  %v3823_v28 = vld [vmem:[%s4355_s22 + $0x764] ss:$20 sps:$4 sm:$0xff]  }
  0xf7   : > { %2489 = vmatprep.mubr.bf16.mxu0 %v4447_v20  ;;  %2653 = vmatprep.mubr.bf16.mxu1 %v4447_v20  ;;  %v3818_v29 = vld [vmem:[%s4355_s22 + $0x758] ss:$20 sps:$4 sm:$0xff]  }
  0xf9   : > { %2460 = vmatpush1.bf16.msra.mxu0 %v3734_v30  ;;  %2624 = vmatpush1.bf16.msra.mxu1 %v3737_v31  ;;  %v3821_v30 = vld [vmem:[%s4355_s22 + $0x760] ss:$20 sps:$4 sm:$0xff]   ;;  %v3827_v31 = vld [vmem:[%s4355_s22 + $0x784] ss:$20 sps:$4 sm:$0xff]  }
  0xfa   : > { %2461 = vmatprep.subr.bf16.mxu0 %v3742_v32  ;;  %2625 = vmatprep.subr.bf16.mxu1 %v3745_v33  ;;  %v3830_v32 = vld [vmem:[%s4355_s22 + $0x78c] ss:$20 sps:$4 sm:$0xff]  }
  0xfb   : > { %v3825_v33 = vld [vmem:[%s4355_s22 + $0x780] ss:$20 sps:$4 sm:$0xff]  }
  0xfd   : > { %2462 = vmatpush1.bf16.msra.mxu0 %v3740_v34  ;;  %2626 = vmatpush1.bf16.msra.mxu1 %v3743_v35  ;;  %v3828_v34 = vld [vmem:[%s4355_s22 + $0x788] ss:$20 sps:$4 sm:$0xff]   ;;  %v3833_v35 = vld [vmem:[%s4355_s22 + $0x7ac] ss:$20 sps:$4 sm:$0xff]  }
  0xfe   : > { %2463 = vmatprep.subr.bf16.mxu0 %v3748_v36  ;;  %2627 = vmatprep.subr.bf16.mxu1 %v3751_v37  ;;  %v3836_v36 = vld [vmem:[%s4355_s22 + $0x7b4] ss:$20 sps:$4 sm:$0xff]  }
  0xff   : > { %v3831_v37 = vld [vmem:[%s4355_s22 + $0x7a8] ss:$20 sps:$4 sm:$0xff]  }
 0x101   : > { %2464 = vmatpush1.bf16.msra.mxu0 %v3746_v38  ;;  %2628 = vmatpush1.bf16.msra.mxu1 %v3749_v39  ;;  %v4599_v38 = vcombine.high %v4447_v20, %v4447_v20  ;;  %v3834_v39 = vld [vmem:[%s4355_s22 + $0x7b0] ss:$20 sps:$4 sm:$0xff]  }
 0x102   : > { %2465 = vmatprep.subr.bf16.mxu0 %v3754_v40  ;;  %2629 = vmatprep.subr.bf16.mxu1 %v3757_v41  ;;  %v3839_v40 = vld [vmem:[%s4355_s22 + $0x7d4] ss:$20 sps:$4 sm:$0xff]   ;;  %v3842_v41 = vld [vmem:[%s4355_s22 + $0x7dc] ss:$20 sps:$4 sm:$0xff]  }
 0x105   : > { %2466 = vmatpush1.bf16.msra.mxu0 %v3752_v43  ;;  %2630 = vmatpush1.bf16.msra.mxu1 %v3755_v44  ;;  %v3837_v43 = vld [vmem:[%s4355_s22 + $0x7d0] ss:$20 sps:$4 sm:$0xff]   ;;  %v3840_v44 = vld [vmem:[%s4355_s22 + $0x7d8] ss:$20 sps:$4 sm:$0xff]  }
 0x106   : > { %2467 = vmatprep.subr.bf16.mxu0 %v3760_v45  ;;  %2631 = vmatprep.subr.bf16.mxu1 %v3763_v46  ;;  %v3845_v45 = vld [vmem:[%s4355_s22 + $0x7fc] ss:$20 sps:$4 sm:$0xff]   ;;  %v3848_v46 = vld [vmem:[%s4355_s22 + $0x804] ss:$20 sps:$4 sm:$0xff]  }
 0x109   : > { %2468 = vmatpush1.bf16.msra.mxu0 %v3758_v47  ;;  %2632 = vmatpush1.bf16.msra.mxu1 %v3761_v48  ;;  %v3843_v47 = vld [vmem:[%s4355_s22 + $0x7f8] ss:$20 sps:$4 sm:$0xff]   ;;  %v3846_v48 = vld [vmem:[%s4355_s22 + $0x800] ss:$20 sps:$4 sm:$0xff]  }
 0x10a   : > { %2469 = vmatprep.subr.bf16.mxu0 %v3766_v49  ;;  %2633 = vmatprep.subr.bf16.mxu1 %v3769_v50  ;;  %v3851_v49 = vld [vmem:[%s4355_s22 + $0x824] ss:$20 sps:$4 sm:$0xff]   ;;  %v3854_v50 = vld [vmem:[%s4355_s22 + $0x82c] ss:$20 sps:$4 sm:$0xff]  }
 0x10d   : > { %2470 = vmatpush1.bf16.msra.mxu0 %v3764_v51  ;;  %2634 = vmatpush1.bf16.msra.mxu1 %v3767_v52  ;;  %v3849_v51 = vld [vmem:[%s4355_s22 + $0x820] ss:$20 sps:$4 sm:$0xff]   ;;  %v3852_v52 = vld [vmem:[%s4355_s22 + $0x828] ss:$20 sps:$4 sm:$0xff]  }
 0x10e   : > { %2471 = vmatprep.subr.bf16.mxu0 %v3772_v53  ;;  %2635 = vmatprep.subr.bf16.mxu1 %v3775_v54  ;;  %v3857_v53 = vld [vmem:[%s4355_s22 + $0x84c] ss:$20 sps:$4 sm:$0xff]   ;;  %v3860_v54 = vld [vmem:[%s4355_s22 + $0x854] ss:$20 sps:$4 sm:$0xff]  }
 0x111   : > { %2472 = vmatpush1.bf16.msra.mxu0 %v3770_v55  ;;  %2636 = vmatpush1.bf16.msra.mxu1 %v3773_v56  ;;  %v3855_v55 = vld [vmem:[%s4355_s22 + $0x848] ss:$20 sps:$4 sm:$0xff]   ;;  %v3858_v56 = vld [vmem:[%s4355_s22 + $0x850] ss:$20 sps:$4 sm:$0xff]  }
 0x112   : > { %2473 = vmatprep.subr.bf16.mxu0 %v3778_v57  ;;  %2637 = vmatprep.subr.bf16.mxu1 %v3781_v58  ;;  %v3863_v57 = vld [vmem:[%s4355_s22 + $0x874] ss:$20 sps:$4 sm:$0xff]   ;;  %v3866_v58 = vld [vmem:[%s4355_s22 + $0x87c] ss:$20 sps:$4 sm:$0xff]  }
 0x115   : > { %2474 = vmatpush1.bf16.msra.mxu0 %v3776_v59  ;;  %2638 = vmatpush1.bf16.msra.mxu1 %v3779_v61  ;;  %v3861_v59 = vld [vmem:[%s4355_s22 + $0x870] ss:$20 sps:$4 sm:$0xff]   ;;  %v3864_v61 = vld [vmem:[%s4355_s22 + $0x878] ss:$20 sps:$4 sm:$0xff]  }
 0x116   : > { %2475 = vmatprep.subr.bf16.mxu0 %v3784_v62  ;;  %2639 = vmatprep.subr.bf16.mxu1 %v3787_v63  ;;  %v3869_v62 = vld [vmem:[%s4355_s22 + $0x89c] ss:$20 sps:$4 sm:$0xff]   ;;  %v3872_v63 = vld [vmem:[%s4355_s22 + $0x8a4] ss:$20 sps:$4 sm:$0xff]  }
 0x119   : > { %2476 = vmatpush1.bf16.msra.mxu0 %v3782_v0  ;;  %2640 = vmatpush1.bf16.msra.mxu1 %v3785_v1  ;;  %v3867_v0 = vld [vmem:[%s4355_s22 + $0x898] ss:$20 sps:$4 sm:$0xff]   ;;  %v3870_v1 = vld [vmem:[%s4355_s22 + $0x8a0] ss:$20 sps:$4 sm:$0xff]  }
 0x11a   : > { %2477 = vmatprep.subr.bf16.mxu0 %v3790_v2  ;;  %2641 = vmatprep.subr.bf16.mxu1 %v3793_v3  ;;  %v3875_v2 = vld [vmem:[%s4355_s22 + $0x8c4] ss:$20 sps:$4 sm:$0xff]   ;;  %v3878_v3 = vld [vmem:[%s4355_s22 + $0x8cc] ss:$20 sps:$4 sm:$0xff]  }
 0x11d   : > { %2478 = vmatpush1.bf16.msra.mxu0 %v3788_v4  ;;  %2642 = vmatpush1.bf16.msra.mxu1 %v3791_v5  ;;  %v3873_v4 = vld [vmem:[%s4355_s22 + $0x8c0] ss:$20 sps:$4 sm:$0xff]   ;;  %v3876_v5 = vld [vmem:[%s4355_s22 + $0x8c8] ss:$20 sps:$4 sm:$0xff]  }
 0x11e   : > { %2479 = vmatprep.subr.bf16.mxu0 %v3796_v6  ;;  %2643 = vmatprep.subr.bf16.mxu1 %v3799_v7  ;;  %v3881_v6 = vld [vmem:[%s4355_s22 + $0x8ec] ss:$20 sps:$4 sm:$0xff]   ;;  %v3884_v7 = vld [vmem:[%s4355_s22 + $0x8f4] ss:$20 sps:$4 sm:$0xff]  }
 0x121   : > { %2480 = vmatpush1.bf16.msra.mxu0 %v3794_v8  ;;  %2644 = vmatpush1.bf16.msra.mxu1 %v3797_v9  ;;  %v3879_v8 = vld [vmem:[%s4355_s22 + $0x8e8] ss:$20 sps:$4 sm:$0xff]   ;;  %v3882_v9 = vld [vmem:[%s4355_s22 + $0x8f0] ss:$20 sps:$4 sm:$0xff]  }
 0x122   : > { %2481 = vmatprep.subr.bf16.mxu0 %v3802_v10  ;;  %2645 = vmatprep.subr.bf16.mxu1 %v3805_v11  ;;  %v3887_v10 = vld [vmem:[%s4355_s22 + $0x914] ss:$20 sps:$4 sm:$0xff]   ;;  %v3890_v11 = vld [vmem:[%s4355_s22 + $0x91c] ss:$20 sps:$4 sm:$0xff]  }
 0x125   : > { %2482 = vmatpush1.bf16.msra.mxu0 %v3800_v12  ;;  %2646 = vmatpush1.bf16.msra.mxu1 %v3803_v13  ;;  %v3885_v12 = vld [vmem:[%s4355_s22 + $0x910] ss:$20 sps:$4 sm:$0xff]   ;;  %v3888_v13 = vld [vmem:[%s4355_s22 + $0x918] ss:$20 sps:$4 sm:$0xff]  }
 0x126   : > { %2483 = vmatprep.subr.bf16.mxu0 %v3808_v14  ;;  %2647 = vmatprep.subr.bf16.mxu1 %v3811_v16  ;;  %v3893_v14 = vld [vmem:[%s4355_s22 + $0x93c] ss:$20 sps:$4 sm:$0xff]   ;;  %v3896_v16 = vld [vmem:[%s4355_s22 + $0x944] ss:$20 sps:$4 sm:$0xff]  }
 0x129   : > { %2484 = vmatpush1.bf16.msra.mxu0 %v3806_v17  ;;  %2648 = vmatpush1.bf16.msra.mxu1 %v3809_v18  ;;  %v3891_v17 = vld [vmem:[%s4355_s22 + $0x938] ss:$20 sps:$4 sm:$0xff]   ;;  %v3894_v18 = vld [vmem:[%s4355_s22 + $0x940] ss:$20 sps:$4 sm:$0xff]  }
 0x12a   : > { %2485 = vmatprep.subr.bf16.mxu0 %v3814_v19  ;;  %2649 = vmatprep.subr.bf16.mxu1 %v3817_v23  ;;  %v3899_v19 = vld [vmem:[%s4355_s22 + $0x964] ss:$20 sps:$4 sm:$0xff]   ;;  %v3902_v23 = vld [vmem:[%s4355_s22 + $0x96c] ss:$20 sps:$4 sm:$0xff]  }
 0x12d   : > { %2486 = vmatpush1.bf16.msra.mxu0 %v3812_v24  ;;  %2650 = vmatpush1.bf16.msra.mxu1 %v3815_v25  ;;  %v3897_v24 = vld [vmem:[%s4355_s22 + $0x960] ss:$20 sps:$4 sm:$0xff]   ;;  %v3900_v25 = vld [vmem:[%s4355_s22 + $0x968] ss:$20 sps:$4 sm:$0xff]  }
 0x12e   : > { %2487 = vmatprep.subr.bf16.mxu0 %v3820_v27  ;;  %2651 = vmatprep.subr.bf16.mxu1 %v3823_v28  ;;  %v3905_v27 = vld [vmem:[%s4355_s22 + $0x98c] ss:$20 sps:$4 sm:$0xff]   ;;  %v3908_v28 = vld [vmem:[%s4355_s22 + $0x994] ss:$20 sps:$4 sm:$0xff]  }
 0x131   : > { %2488 = vmatpush1.bf16.msra.mxu0 %v3818_v29  ;;  %2652 = vmatpush1.bf16.msra.mxu1 %v3821_v30  ;;  %v3903_v29 = vld [vmem:[%s4355_s22 + $0x988] ss:$20 sps:$4 sm:$0xff]   ;;  %v3906_v30 = vld [vmem:[%s4355_s22 + $0x990] ss:$20 sps:$4 sm:$0xff]  }
 0x132   : > { %2498 = vmatprep.subr.bf16.mxu0 %v3827_v31  ;;  %2662 = vmatprep.subr.bf16.mxu1 %v3830_v32  ;;  %v3911_v31 = vld [vmem:[%s4355_s22 + $0x9b4] ss:$20 sps:$4 sm:$0xff]   ;;  %v3914_v32 = vld [vmem:[%s4355_s22 + $0x9bc] ss:$20 sps:$4 sm:$0xff]  }
 0x134   : > { %2490 = vmatmul.mubr.bf16.vlgmr.msra.gmra.mrb[0].mxu0 %v4450_v21  ;;  %2654 = vmatmul.mubr.bf16.vlgmr.msra.gmra.mrb[0].mxu1 %v4450_v21 }
 0x135   : > { %2499 = vmatpush1.bf16.msra.mxu0 %v3825_v33  ;;  %2663 = vmatpush1.bf16.msra.mxu1 %v3828_v34  ;;  %v3909_v33 = vld [vmem:[%s4355_s22 + $0x9b0] ss:$20 sps:$4 sm:$0xff]   ;;  %v3912_v34 = vld [vmem:[%s4355_s22 + $0x9b8] ss:$20 sps:$4 sm:$0xff]  }
 0x136   : > { %2500 = vmatprep.subr.bf16.mxu0 %v3833_v35  ;;  %2664 = vmatprep.subr.bf16.mxu1 %v3836_v36  ;;  %v3917_v35 = vld [vmem:[%s4355_s22 + $0x9dc] ss:$20 sps:$4 sm:$0xff]   ;;  %v3920_v36 = vld [vmem:[%s4355_s22 + $0x9e4] ss:$20 sps:$4 sm:$0xff]  }
 0x137   : > { %2530 = vmatprep.mubr.bf16.mxu0 %v4599_v38  ;;  %2694 = vmatprep.mubr.bf16.mxu1 %v4599_v38 }
 0x139   : > { %2501 = vmatpush1.bf16.msra.mxu0 %v3831_v37  ;;  %2665 = vmatpush1.bf16.msra.mxu1 %v3834_v39  ;;  %v3915_v37 = vld [vmem:[%s4355_s22 + $0x9d8] ss:$20 sps:$4 sm:$0xff]   ;;  %v3918_v39 = vld [vmem:[%s4355_s22 + $0x9e0] ss:$20 sps:$4 sm:$0xff]  }
 0x13a   : > { %2502 = vmatprep.subr.bf16.mxu0 %v3839_v40  ;;  %2666 = vmatprep.subr.bf16.mxu1 %v3842_v41  ;;  %v3921_v40 = vld [vmem:[%s4355_s22 + $0x150] ss:$20 sps:$4 sm:$0xff]  }
 0x13b   : > { %v3922_v41 = vld [vmem:[%s4355_s22 + $0x3d0] ss:$20 sps:$4 sm:$0xff]  }
 0x13d   : > { %2503 = vmatpush1.bf16.msra.mxu0 %v3837_v43  ;;  %2667 = vmatpush1.bf16.msra.mxu1 %v3840_v44  ;;  %v4666_v43 = vcombine.high %v4450_v21, %v4450_v21  ;;  %v3923_v44 = vld [vmem:[%s4355_s22 + $0x10] ss:$20 sps:$4 sm:$0xff]  }
 0x13e   : > { %2504 = vmatprep.subr.bf16.mxu0 %v3845_v45  ;;  %2668 = vmatprep.subr.bf16.mxu1 %v3848_v46  ;;  %v3924_v45 = vld [vmem:[%s4355_s22 + $0x290] ss:$20 sps:$4 sm:$0xff]   ;;  %v3925_v46 = vld [vmem:[%s4355_s22 + $0x178] ss:$20 sps:$4 sm:$0xff]  }
 0x141   : > { %2505 = vmatpush1.bf16.msra.mxu0 %v3843_v47  ;;  %2669 = vmatpush1.bf16.msra.mxu1 %v3846_v48  ;;  %v3926_v47 = vld [vmem:[%s4355_s22 + $0x3f8] ss:$20 sps:$4 sm:$0xff]  }
 0x142   : > { %2506 = vmatprep.subr.bf16.mxu0 %v3851_v49  ;;  %2670 = vmatprep.subr.bf16.mxu1 %v3854_v50  ;;  %v3927_v48 = vld [vmem:[%s4355_s22 + $0x38] ss:$20 sps:$4 sm:$0xff]   ;;  %v3929_v50 = vld [vmem:[%s4355_s22 + $0x1a0] ss:$20 sps:$4 sm:$0xff]  }
 0x143   : > { %v3928_v49 = vld [vmem:[%s4355_s22 + $0x2b8] ss:$20 sps:$4 sm:$0xff]  }
 0x145   : > { %2507 = vmatpush1.bf16.msra.mxu0 %v3849_v51  ;;  %2671 = vmatpush1.bf16.msra.mxu1 %v3852_v52  ;;  %v3930_v51 = vld [vmem:[%s4355_s22 + $0x420] ss:$20 sps:$4 sm:$0xff]  }
 0x146   : > { %2508 = vmatprep.subr.bf16.mxu0 %v3857_v53  ;;  %2672 = vmatprep.subr.bf16.mxu1 %v3860_v54  ;;  %v3931_v52 = vld [vmem:[%s4355_s22 + $0x60] ss:$20 sps:$4 sm:$0xff]   ;;  %v3933_v54 = vld [vmem:[%s4355_s22 + $0x1c8] ss:$20 sps:$4 sm:$0xff]  }
 0x147   : > { %v3932_v53 = vld [vmem:[%s4355_s22 + $0x2e0] ss:$20 sps:$4 sm:$0xff]  }
 0x149   : > { %2509 = vmatpush1.bf16.msra.mxu0 %v3855_v55  ;;  %2673 = vmatpush1.bf16.msra.mxu1 %v3858_v56  ;;  %v3934_v55 = vld [vmem:[%s4355_s22 + $0x448] ss:$20 sps:$4 sm:$0xff]  }
 0x14a   : > { %2510 = vmatprep.subr.bf16.mxu0 %v3863_v57  ;;  %2674 = vmatprep.subr.bf16.mxu1 %v3866_v58  ;;  %v3935_v56 = vld [vmem:[%s4355_s22 + $0x88] ss:$20 sps:$4 sm:$0xff]   ;;  %v3938_v57 = vld [vmem:[%s4355_s22 + $0x470] ss:$20 sps:$4 sm:$0xff]  }
 0x14b   : > { %v3939_v58 = vld [vmem:[%s4355_s22 + $0xb0] ss:$20 sps:$4 sm:$0xff]  }
 0x14d   : > { %2511 = vmatpush1.bf16.msra.mxu0 %v3861_v59  ;;  %2675 = vmatpush1.bf16.msra.mxu1 %v3864_v61  ;;  %v3940_v59 = vld [vmem:[%s4355_s22 + $0x330] ss:$20 sps:$4 sm:$0xff]   ;;  %v3941_v61 = vld [vmem:[%s4355_s22 + $0x218] ss:$20 sps:$4 sm:$0xff]  }
 0x14e   : > { %2512 = vmatprep.subr.bf16.mxu0 %v3869_v62  ;;  %2676 = vmatprep.subr.bf16.mxu1 %v3872_v63  ;;  %v3942_v62 = vld [vmem:[%s4355_s22 + $0x498] ss:$20 sps:$4 sm:$0xff]  }
 0x14f   : > { %v3943_v63 = vld [vmem:[%s4355_s22 + $0xd8] ss:$20 sps:$4 sm:$0xff]  }
 0x151   : > { %2513 = vmatpush1.bf16.msra.mxu0 %v3867_v0  ;;  %2677 = vmatpush1.bf16.msra.mxu1 %v3870_v1  ;;  %v3944_v0 = vld [vmem:[%s4355_s22 + $0x358] ss:$20 sps:$4 sm:$0xff]   ;;  %v3945_v1 = vld [vmem:[%s4355_s22 + $0x240] ss:$20 sps:$4 sm:$0xff]  }
 0x152   : > { %2514 = vmatprep.subr.bf16.mxu0 %v3875_v2  ;;  %2678 = vmatprep.subr.bf16.mxu1 %v3878_v3  ;;  %v3946_v2 = vld [vmem:[%s4355_s22 + $0x4c0] ss:$20 sps:$4 sm:$0xff]  }
 0x153   : > { %v3947_v3 = vld [vmem:[%s4355_s22 + $0x100] ss:$20 sps:$4 sm:$0xff]  }
 0x155   : > { %2515 = vmatpush1.bf16.msra.mxu0 %v3873_v4  ;;  %2679 = vmatpush1.bf16.msra.mxu1 %v3876_v5  ;;  %v3948_v4 = vld [vmem:[%s4355_s22 + $0x380] ss:$20 sps:$4 sm:$0xff]   ;;  %v3949_v5 = vld [vmem:[%s4355_s22 + $0x268] ss:$20 sps:$4 sm:$0xff]  }
 0x156   : > { %2516 = vmatprep.subr.bf16.mxu0 %v3881_v6  ;;  %2680 = vmatprep.subr.bf16.mxu1 %v3884_v7  ;;  %v3950_v6 = vld [vmem:[%s4355_s22 + $0x4e8] ss:$20 sps:$4 sm:$0xff]  }
 0x157   : > { %v3951_v7 = vld [vmem:[%s4355_s22 + $0x128] ss:$20 sps:$4 sm:$0xff]  }
 0x159   : > { %2517 = vmatpush1.bf16.msra.mxu0 %v3879_v8  ;;  %2681 = vmatpush1.bf16.msra.mxu1 %v3882_v9  ;;  %v3952_v8 = vld [vmem:[%s4355_s22 + $0x3a8] ss:$20 sps:$4 sm:$0xff]   ;;  %v3953_v9 = vld [vmem:[%s4355_s22 + $0x650] ss:$20 sps:$4 sm:$0xff]  }
 0x15a   : > { %2518 = vmatprep.subr.bf16.mxu0 %v3887_v10  ;;  %2682 = vmatprep.subr.bf16.mxu1 %v3890_v11  ;;  %v3954_v10 = vld [vmem:[%s4355_s22 + $0x8d0] ss:$20 sps:$4 sm:$0xff]  }
 0x15b   : > { %v3955_v11 = vld [vmem:[%s4355_s22 + $0x510] ss:$20 sps:$4 sm:$0xff]  }
 0x15d   : > { %2519 = vmatpush1.bf16.msra.mxu0 %v3885_v12  ;;  %2683 = vmatpush1.bf16.msra.mxu1 %v3888_v13  ;;  %v3956_v12 = vld [vmem:[%s4355_s22 + $0x790] ss:$20 sps:$4 sm:$0xff]   ;;  %v3957_v13 = vld [vmem:[%s4355_s22 + $0x678] ss:$20 sps:$4 sm:$0xff]  }
 0x15e   : > { %2520 = vmatprep.subr.bf16.mxu0 %v3893_v14  ;;  %2684 = vmatprep.subr.bf16.mxu1 %v3896_v16  ;;  %v3958_v14 = vld [vmem:[%s4355_s22 + $0x8f8] ss:$20 sps:$4 sm:$0xff]  }
 0x15f   : > { %v3959_v16 = vld [vmem:[%s4355_s22 + $0x538] ss:$20 sps:$4 sm:$0xff]  }
 0x161   : > { %2521 = vmatpush1.bf16.msra.mxu0 %v3891_v17  ;;  %2685 = vmatpush1.bf16.msra.mxu1 %v3894_v18  ;;  %v3960_v17 = vld [vmem:[%s4355_s22 + $0x7b8] ss:$20 sps:$4 sm:$0xff]   ;;  %v3961_v18 = vld [vmem:[%s4355_s22 + $0x6a0] ss:$20 sps:$4 sm:$0xff]  }
 0x162   : > { %2522 = vmatprep.subr.bf16.mxu0 %v3899_v19  ;;  %2686 = vmatprep.subr.bf16.mxu1 %v3902_v23  ;;  %v3962_v19 = vld [vmem:[%s4355_s22 + $0x920] ss:$20 sps:$4 sm:$0xff]   ;;  %v3965_v23 = vld [vmem:[%s4355_s22 + $0x6c8] ss:$20 sps:$4 sm:$0xff]  }
 0x165   : > { %2523 = vmatpush1.bf16.msra.mxu0 %v3897_v24  ;;  %2687 = vmatpush1.bf16.msra.mxu1 %v3900_v25  ;;  %v3966_v24 = vld [vmem:[%s4355_s22 + $0x948] ss:$20 sps:$4 sm:$0xff]  }
 0x166   : > { %2524 = vmatprep.subr.bf16.mxu0 %v3905_v27  ;;  %2688 = vmatprep.subr.bf16.mxu1 %v3908_v28  ;;  %v3967_v25 = vld [vmem:[%s4355_s22 + $0x588] ss:$20 sps:$4 sm:$0xff]   ;;  %v3970_v27 = vld [vmem:[%s4355_s22 + $0x970] ss:$20 sps:$4 sm:$0xff]  }
 0x167   : > { %v3971_v28 = vld [vmem:[%s4355_s22 + $0x5b0] ss:$20 sps:$4 sm:$0xff]  }
 0x169   : > { %2525 = vmatpush1.bf16.msra.mxu0 %v3903_v29  ;;  %2689 = vmatpush1.bf16.msra.mxu1 %v3906_v30  ;;  %v3972_v29 = vld [vmem:[%s4355_s22 + $0x830] ss:$20 sps:$4 sm:$0xff]   ;;  %v3973_v30 = vld [vmem:[%s4355_s22 + $0x718] ss:$20 sps:$4 sm:$0xff]  }
 0x16a   : > { %2526 = vmatprep.subr.bf16.mxu0 %v3911_v31  ;;  %2690 = vmatprep.subr.bf16.mxu1 %v3914_v32  ;;  %v3974_v31 = vld [vmem:[%s4355_s22 + $0x998] ss:$20 sps:$4 sm:$0xff]  }
 0x16b   : > { %v3975_v32 = vld [vmem:[%s4355_s22 + $0x5d8] ss:$20 sps:$4 sm:$0xff]  }
 0x16d   : > { %2527 = vmatpush1.bf16.msra.mxu0 %v3909_v33  ;;  %2691 = vmatpush1.bf16.msra.mxu1 %v3912_v34  ;;  %v3976_v33 = vld [vmem:[%s4355_s22 + $0x858] ss:$20 sps:$4 sm:$0xff]   ;;  %v3977_v34 = vld [vmem:[%s4355_s22 + $0x740] ss:$20 sps:$4 sm:$0xff]  }
 0x16e   : > { %2528 = vmatprep.subr.bf16.mxu0 %v3917_v35  ;;  %2692 = vmatprep.subr.bf16.mxu1 %v3920_v36  ;;  %v3978_v35 = vld [vmem:[%s4355_s22 + $0x9c0] ss:$20 sps:$4 sm:$0xff]  }
 0x16f   : > { %v3979_v36 = vld [vmem:[%s4355_s22 + $0x600] ss:$20 sps:$4 sm:$0xff]  }
 0x171   : > { %2529 = vmatpush1.bf16.msra.mxu0 %v3915_v37  ;;  %2693 = vmatpush1.bf16.msra.mxu1 %v3918_v39  ;;  %v3980_v37 = vld [vmem:[%s4355_s22 + $0x880] ss:$20 sps:$4 sm:$0xff]   ;;  %v3981_v39 = vld [vmem:[%s4355_s22 + $0x768] ss:$20 sps:$4 sm:$0xff]  }
 0x172   : > { %3348 = vmatprep.subr.bf16.mxu0 %v3921_v40  ;;  %3370 = vmatprep.subr.bf16.mxu1 %v3922_v41  ;;  %v3982_v40 = vld [vmem:[%s4355_s22 + $0x9e8] ss:$20 sps:$4 sm:$0xff]  }
 0x173   : > { %v3983_v41 = vld [vmem:[%s4355_s22 + $0x628] ss:$20 sps:$4 sm:$0xff]  }
 0x174   : > { %2531 = vmatmul.mubr.bf16.vlgmr.msra.gmra.mrb[0].mxu0 %v4666_v43  ;;  %2695 = vmatmul.mubr.bf16.vlgmr.msra.gmra.mrb[0].mxu1 %v4666_v43 }
 0x175   : > { %3349 = vmatpush3.bf16.msra.mxu0 %v3923_v44  ;;  %3371 = vmatpush3.bf16.msra.mxu1 %v3924_v45  ;;  %v3984_v44 = vld [vmem:[%s4355_s22 + $0x8a8] ss:$20 sps:$4 sm:$0xff]   ;;  %v630_v45 = vsub.s32 0, %v4400_v42 }
 0x176   : > { %3350 = vmatprep.subr.bf16.mxu0 %v3925_v46  ;;  %3372 = vmatprep.subr.bf16.mxu1 %v3926_v47  ;;  %v638_v46 = vsub.s32 2, %v4400_v42  ;;  %v626_v47 = vld [vmem:[%s209_s28] sm:$0x1f] }
 0x177   : > { %2735 = vmatprep.mubr.bf16.mxu0 %v4419_v60  ;;  %2775 = vmatprep.mubr.bf16.mxu1 %v4454_v22  ;;  %v3936_v60 = vld [vmem:[%s4355_s22 + $0x308] ss:$20 sps:$4 sm:$0xff]   ;;  %v3937_v22 = vld [vmem:[%s4355_s22 + $0x1f0] ss:$20 sps:$4 sm:$0xff]  }
 0x179   : > { %3351 = vmatpush3.bf16.msra.mxu0 %v3927_v48  ;;  %3373 = vmatpush3.bf16.msra.mxu1 %v3928_v49  ;;  %v634_v48 = vsub.s32 1, %v4400_v42  ;;  %v4152_v49 = vmov 1983009808  }
 0x17a   : > { %3352 = vmatprep.subr.bf16.mxu0 %v3929_v50  ;;  %3374 = vmatprep.subr.bf16.mxu1 %v3930_v51  ;;  %v2871_v50 = vunpack.c.l.s4 %v4152_v49  ;;  %v642_v51 = vsub.s32 3, %v4400_v42 }
 0x17d   : > { %3353 = vmatpush3.bf16.msra.mxu0 %v3931_v52  ;;  %3375 = vmatpush3.bf16.msra.mxu1 %v3932_v53  ;;  %v631_v52 = vrot.slane %v626_v47, %v630_v45  ;;  %v639_v53 = vrot.slane %v626_v47, %v638_v46 }
 0x17e   : > { %3354 = vmatprep.subr.bf16.mxu0 %v3933_v54  ;;  %3376 = vmatprep.subr.bf16.mxu1 %v3934_v55  ;;  %v635_v54 = vrot.slane %v626_v47, %v634_v48  ;;  %v643_v55 = vrot.slane %v626_v47, %v642_v51 }
 0x181   : > { %3355 = vmatpush3.bf16.msra.mxu0 %v3935_v56  ;;  %3377 = vmatpush3.bf16.msra.mxu1 %v3936_v60 }
 0x182   : > { %3356 = vmatprep.subr.bf16.mxu0 %v3937_v22  ;;  %3378 = vmatprep.subr.bf16.mxu1 %v3938_v57 }
 0x185   : > { %3357 = vmatpush3.bf16.msra.mxu0 %v3939_v58  ;;  %3379 = vmatpush3.bf16.msra.mxu1 %v3940_v59 }
 0x186   : > { %3358 = vmatprep.subr.bf16.mxu0 %v3941_v61  ;;  %3380 = vmatprep.subr.bf16.mxu1 %v3942_v62 }
 0x189   : > { %3359 = vmatpush3.bf16.msra.mxu0 %v3943_v63  ;;  %3381 = vmatpush3.bf16.msra.mxu1 %v3944_v0 }
 0x18a   : > { %3360 = vmatprep.subr.bf16.mxu0 %v3945_v1  ;;  %3382 = vmatprep.subr.bf16.mxu1 %v3946_v2 }
 0x18d   : > { %3361 = vmatpush3.bf16.msra.mxu0 %v3947_v3  ;;  %3383 = vmatpush3.bf16.msra.mxu1 %v3948_v4 }
 0x18e   : > { %3362 = vmatprep.subr.bf16.mxu0 %v3949_v5  ;;  %3384 = vmatprep.subr.bf16.mxu1 %v3950_v6 }
 0x191   : > { %3363 = vmatpush3.bf16.msra.mxu0 %v3951_v7  ;;  %3385 = vmatpush3.bf16.msra.mxu1 %v3952_v8  ;;  %v646_v8 = vsub.s32 4, %v4400_v42 }
 0x192   : > { %3392 = vmatprep.subr.bf16.mxu0 %v3953_v9  ;;  %3414 = vmatprep.subr.bf16.mxu1 %v3954_v10 }
 0x194   : > { %2736 = vmatmul.mubr.bf16.vlgmr.msra.gmra.mrb[4].mxu0 %v4441_v15  ;;  %2776 = vmatmul.mubr.bf16.vlgmr.msra.gmra.mrb[4].mxu1 %v4523_v26  ;;  %v3963_v15 = vld [vmem:[%s4355_s22 + $0x560] ss:$20 sps:$4 sm:$0xff]  }
 0x195   : > { %3393 = vmatpush3.bf16.msra.mxu0 %v3955_v11  ;;  %3415 = vmatpush3.bf16.msra.mxu1 %v3956_v12  ;;  %v3964_v26 = vld [vmem:[%s4355_s22 + $0x7e0] ss:$20 sps:$4 sm:$0xff]   ;;  %v647_v11 = vrot.slane %v626_v47, %v646_v8 }
 0x196   : > { %3394 = vmatprep.subr.bf16.mxu0 %v3957_v13  ;;  %3416 = vmatprep.subr.bf16.mxu1 %v3958_v14 }
 0x197   : > { %2815 = vmatprep.mubr.bf16.mxu0 %v4447_v20  ;;  %2855 = vmatprep.mubr.bf16.mxu1 %v4599_v38  ;;  %v3968_v20 = vld [vmem:[%s4355_s22 + $0x808] ss:$20 sps:$4 sm:$0xff]   ;;  %v3969_v38 = vld [vmem:[%s4355_s22 + $0x6f0] ss:$20 sps:$4 sm:$0xff]  }
 0x199   : > { %3395 = vmatpush3.bf16.msra.mxu0 %v3959_v16  ;;  %3417 = vmatpush3.bf16.msra.mxu1 %v3960_v17 }
 0x19a   : > { %3396 = vmatprep.subr.bf16.mxu0 %v3961_v18  ;;  %3418 = vmatprep.subr.bf16.mxu1 %v3962_v19 }
 0x19d   : > { %3397 = vmatpush3.bf16.msra.mxu0 %v3963_v15  ;;  %3419 = vmatpush3.bf16.msra.mxu1 %v3964_v26 }
 0x19e   : > { %3398 = vmatprep.subr.bf16.mxu0 %v3965_v23  ;;  %3420 = vmatprep.subr.bf16.mxu1 %v3966_v24 }
 0x1a1   : > { %3399 = vmatpush3.bf16.msra.mxu0 %v3967_v25  ;;  %3421 = vmatpush3.bf16.msra.mxu1 %v3968_v20 }
 0x1a2   : > { %3400 = vmatprep.subr.bf16.mxu0 %v3969_v38  ;;  %3422 = vmatprep.subr.bf16.mxu1 %v3970_v27 }
 0x1a5   : > { %3401 = vmatpush3.bf16.msra.mxu0 %v3971_v28  ;;  %3423 = vmatpush3.bf16.msra.mxu1 %v3972_v29 }
 0x1a6   : > { %3402 = vmatprep.subr.bf16.mxu0 %v3973_v30  ;;  %3424 = vmatprep.subr.bf16.mxu1 %v3974_v31 }
 0x1a9   : > { %3403 = vmatpush3.bf16.msra.mxu0 %v3975_v32  ;;  %3425 = vmatpush3.bf16.msra.mxu1 %v3976_v33 }
 0x1aa   : > { %3404 = vmatprep.subr.bf16.mxu0 %v3977_v34  ;;  %3426 = vmatprep.subr.bf16.mxu1 %v3978_v35 }
 0x1ad   : > { %3405 = vmatpush3.bf16.msra.mxu0 %v3979_v36  ;;  %3427 = vmatpush3.bf16.msra.mxu1 %v3980_v37 }
 0x1ae   : > { %3406 = vmatprep.subr.bf16.mxu0 %v3981_v39  ;;  %3428 = vmatprep.subr.bf16.mxu1 %v3982_v40 }
 0x1b1   : > { %3407 = vmatpush3.bf16.msra.mxu0 %v3983_v41  ;;  %3429 = vmatpush3.bf16.msra.mxu1 %v3984_v44 }
 0x1b4   : > { %2816 = vmatmul.mubr.bf16.vlgmr.msra.gmra.mrb[8].mxu0 %v4450_v21  ;;  %2856 = vmatmul.mubr.bf16.vlgmr.msra.gmra.mrb[8].mxu1 %v4666_v43  ;;  %v2872_v21 = vunpack.c.0.s8 %v2871_v50 }
 0x1b6   : > { %v2875_v61 = vsub.s32 %v2872_v21, %v4400_v42 }
 0x247   : > { %v2532_v43 = vpop.f32.mrb[0].mxu0  ;;  %v2696_v56 = vpop.f32.mrb[0].mxu1 }
 0x248   : > { %v3436_v60 = vadd.f32 %v2532_v43, %v631_v52  ;;  %v3438_v22 = vadd.f32 %v2696_v56, %v639_v53  ;;  %v2534_v57 = vpop.f32.mrb[1].mxu0  ;;  %v2698_v58 = vpop.f32.mrb[1].mxu1 }
 0x249   : > { %v3437_v59 = vadd.f32 %v2534_v57, %v635_v54  ;;  %v3439_v62 = vadd.f32 %v2698_v58, %v643_v55  ;;  %v2536_v63 = vpop.f32.mrb[2].mxu0  ;;  %v2700_v0 = vpop.f32.mrb[2].mxu1 }
 0x24a   : > { %v2537_v1 = vpop.f32.mrb[3].mxu0  ;;  %v2701_v2 = vpop.f32.mrb[3].mxu1 }
 0x24b   : > { %v2868_v3 = vcombine.low %v3436_v60, %v3437_v59  ;;  %v2869_v4 = vcombine.low %v3438_v22, %v3439_v62 }
 0x24d   : > { %v2876_v5 = vrot.slane %v2868_v3, %v2875_v61  ;;  %v2883_v6 = vrot.slane %v2869_v4, %v2875_v61 }
 0x24f   : > { %v2884_v7 = vcombine.low %v2876_v5, %v2883_v6 }
 0x251   : > { %2894 = vst [vmem:[%s4747_s17] sm:$0xff] %v2884_v7 }
 0x267   : > { %v3364_v9 = vpop.f32.mrb[4].mxu0  ;;  %v3386_v10 = vpop.f32.mrb[4].mxu1 }
 0x268   : > { %v3365_v12 = vpop.f32.mrb[5].mxu0  ;;  %v3387_v13 = vpop.f32.mrb[5].mxu1 }
 0x269   : > { %v3366_v14 = vadd.f32 %v3365_v12, %v3364_v9  ;;  %v3388_v16 = vadd.f32 %v3387_v13, %v3386_v10  ;;  %v3367_v17 = vpop.f32.mrb[6].mxu0  ;;  %v3389_v18 = vpop.f32.mrb[6].mxu1 }
 0x26a   : > { %v3368_v19 = vpop.f32.mrb[7].mxu0  ;;  %v3390_v15 = vpop.f32.mrb[7].mxu1 }
 0x26b   : > { %v2738_v26 = vadd.f32 %v3366_v14, %v647_v11 }
 0x26d   : > { %v2778_v23 = vadd.f32 %v3388_v16, %v2738_v26 }
 0x287   : > { %v3408_v24 = vpop.f32.mrb[8].mxu0  ;;  %v3430_v25 = vpop.f32.mrb[8].mxu1 }
 0x288   : > { %v3409_v42 = vpop.f32.mrb[9].mxu0  ;;  %v3431_v20 = vpop.f32.mrb[9].mxu1 }
 0x289   : > { %v3410_v38 = vadd.f32 %v3409_v42, %v3408_v24  ;;  %v3432_v27 = vadd.f32 %v3431_v20, %v3430_v25  ;;  %v3411_v28 = vpop.f32.mrb[10].mxu0  ;;  %v3433_v29 = vpop.f32.mrb[10].mxu1 }
 0x28a   : > { %v3412_v30 = vpop.f32.mrb[11].mxu0  ;;  %v3434_v31 = vpop.f32.mrb[11].mxu1 }
 0x28b   : > { %v2818_v32 = vadd.f32 %v3410_v38, %v2778_v23 }
 0x28d   : > { %v2858_v33 = vadd.f32 %v3432_v27, %v2818_v32 }
 0x28f   : > { %3341 = vst.sshfl [vmem:[%s4747_s17 + $0x8] sm:$0x3 pattern:$0x76325410] %v2858_v33 }
 0x290   : > { %4086 = shalt.err (!%p4083_p1)
}
 0x291   : > { %s4087_s8 = scalar_lea.hbm %s4756_s5, 160  ;;  %s4091_s21 = scalar_lea.hbm %s4804_s3, 320 }
 0x292   : > { %p4088_p6 = scmp.ne.s32.totalorder %s4756_s5, %s4087_s8  ;;  %p4092_p7 = scmp.lt.u32.totalorder %s4756_s5, %s4804_s3 }
 0x293   : > { %p4093_p9 = scmp.lt.u32.totalorder %s4091_s21, %s4087_s8  ;;  %p4095_p12 = scmp.lt.u32.totalorder %s4087_s8, %s4756_s5 }
 0x294   : > { %p4089_p5 = pnand %p4088_p6, %p4825_p4 }
 0x295   : > { %p4094_p10 = por %p4093_p9, %p4092_p7 }
 0x296   : > { %p4090_p2 = pneg %p4089_p5 }
 0x297   : > { %p4096_p0 = por %p4095_p12, %p4094_p10 }
 0x299   : > { %p4097_p11 = pnand %p4096_p0, %p4090_p2 }
 0x29b   : > { %4100 = shalt.err (!%p4097_p11)
}
 0x29c   : > { %3477 = dma.vmem_to_hbm [thread:$0]  (%p4825_p4), %s4758_s24, 160, %s4756_s5, %s2897_s6  }
 0x29d PF: > { %s2923_s28 = sand.u32 1, %s4131_s12   ;;  %p4826_p13 = scmp.ne.s32.totalorder %s4815_s29, 0 }
 0x29e   : > { %p4827_p3 = scmp.ge.s32.totalorder %s4143_s15, 2  ;;  %s2924_s4 = scalar_lea.sflag [#allocation4], %s2923_s28 }
 0x2a0   : > { %p3491_p8 = pnand %p4827_p3, %p4826_p13 }
 0x2a2   : > { %4126 = dma.done.wait (!%p3491_p8), %s2924_s4, 160  }
 0x2a3   : > { %4128 = vsyncadd (!%p3491_p8), %s2924_s4, 4294967136  ;;  %p17_p1 = scmp.ge.s32.totalorder %s4195_s16, 4   ;;  %s4828_s12 = smov %s4135_s13 }
 0x2a4   : > { %s4829_s13 = smov %s4139_s14  ;;  %s4830_s14 = smov %s4206_s19 }
 0x2a5   : > { %s4831_s15 = smov %s4195_s16  ;;  %19 = sbr.rel (!%p17_p1) target bundleno = 6 (0x6), region = 93 }
 0x2ac   :  { %2929 = vsyncpa [#allocation3], 1 }
 0x2ad   :  { %2931 = vsyncpa [#allocation3 + $0x1], 1 }
 0x2ae   :  { %2932 = vsyncpa [#allocation6], 1 }
 0x2af   :  { %2934 = vsyncpa [#allocation6 + $0x1], 1 }
 0x2b0   :  { %2935 = vsyncpa [#allocation4], 1 }
 0x2b1   :  { %2937 = vsyncpa [#allocation4 + $0x1], 1 }

</bundles_post_ra>
